<compile_context>
chip_gen: v5e
topology: v5e:2x2
jax: 0.10.0
libtpu: 0.0.40
codegen_flags: <defaults>
</compile_context>

<pallas_src>
import functools

import jax
import jax.numpy as jnp
import numpy as np
from jax.experimental import pallas as pl
from jax.experimental.pallas import tpu as pltpu


def bin_lstm_kernel(x_ref, wih_cat_ref, b_cat_ref, whh_f_ref, whh_b_ref,
                    wemb_ref, bemb_ref, out_ref, gin_scr, h_scr, *, T, B, H):
    """x_ref: (T*B, nIn); gates layout follows PyTorch: [i | f | g | o]."""
    G = 4 * H

    # --- Hoisted input projection (both directions at once, bias folded in).
    # (T*B, nIn) @ (nIn, 8H) + (1, 8H)  ->  (T*B, 8H) staged in VMEM scratch.
    gin_scr[...] = (jnp.dot(x_ref[...], wih_cat_ref[...],
                            preferred_element_type=jnp.float32)
                    + b_cat_ref[...])

    # Recurrent weights, pre-transposed on host to (H, 4H): lane-dense MXU rhs.
    whh_f = whh_f_ref[...]
    whh_b = whh_b_ref[...]

    zeros = jnp.zeros((B, H), jnp.float32)

    def step(s, carry):
        hf, cf, hb, cb = carry
        tb = T - 1 - s                      # original time index for bwd dir

        # Serial chain per direction is just h @ Whh (+ precomputed slice).
        gf = gin_scr[pl.ds(s * B, B), :G] + jnp.dot(
            hf, whh_f, preferred_element_type=jnp.float32)
        gb = gin_scr[pl.ds(tb * B, B), G:] + jnp.dot(
            hb, whh_b, preferred_element_type=jnp.float32)

        # One sigmoid over the whole 4H-wide gate row, tanh only on g slice.
        sf = jax.nn.sigmoid(gf)
        sb = jax.nn.sigmoid(gb)
        cf = sf[:, H:2 * H] * cf + sf[:, :H] * jnp.tanh(gf[:, 2 * H:3 * H])
        cb = sb[:, H:2 * H] * cb + sb[:, :H] * jnp.tanh(gb[:, 2 * H:3 * H])
        hf = sf[:, 3 * H:] * jnp.tanh(cf)
        hb = sb[:, 3 * H:] * jnp.tanh(cb)

        # Merged hidden-state slab: fwd -> cols [:H], bwd -> cols [H:], row
        # block of the ORIGINAL time index (PyTorch bidirectional semantics).
        h_scr[pl.ds(s * B, B), :H] = hf
        h_scr[pl.ds(tb * B, B), H:] = hb
        return hf, cf, hb, cb

    jax.lax.fori_loop(0, T, step, (zeros, zeros, zeros, zeros), unroll=True)

    # --- Embedding: single (T*B, 2H) @ (2H, nOut) matmul, bias added.
    out_ref[...] = (jnp.dot(h_scr[...], wemb_ref[...],
                            preferred_element_type=jnp.float32)
                    + bemb_ref[...])


def bin_lstm(x, params):
    T, B, n_in = x.shape
    H = params["whh_f"].shape[1]
    n_out = params["wemb"].shape[0]

    # Host-side weight prep (free; keeps every in-kernel MXU rhs lane-dense).
    wih_cat = jnp.concatenate([params["wih_f"].T, params["wih_b"].T], axis=1)  # (nIn, 8H)
    b_cat = jnp.concatenate([params["b_f"], params["b_b"]], axis=1)            # (1, 8H)
    whh_f_t = params["whh_f"].T                                                # (H, 4H)
    whh_b_t = params["whh_b"].T                                                # (H, 4H)
    wemb_t = params["wemb"].T                                                  # (2H, nOut)
    bemb = params["bemb"]                                                      # (1, nOut)

    x2 = x.reshape(T * B, n_in)  # flatten outside the kernel (no in-kernel reshape)

    args = (x2, wih_cat, b_cat, whh_f_t, whh_b_t, wemb_t, bemb)
    vmem = lambda: pl.BlockSpec(memory_space=pltpu.MemorySpace.VMEM)

    # TODO(synk): for production-scale T/B/H, tile over T (grid axis marked
    # "arbitrary") instead of keeping x / gates / hidden fully VMEM-resident,
    # and on v7x split the two directions across the 2 TensorCores.
    out2 = pl.pallas_call(
        functools.partial(bin_lstm_kernel, T=T, B=B, H=H),
        out_shape=jax.ShapeDtypeStruct((T * B, n_out), jnp.float32),
        in_specs=[vmem() for _ in args],
        out_specs=vmem(),
        scratch_shapes=[
            pltpu.VMEM((T * B, 8 * H), jnp.float32),  # precomputed input gates
            pltpu.VMEM((T * B, 2 * H), jnp.float32),  # merged fwd|bwd hidden
        ],
    )(*args)
    return out2.reshape(T, B, n_out)


def init_params(key, n_in, n_hidden, n_out):
    """Deterministic synthetic params, PyTorch-style U(-1/sqrt(H), 1/sqrt(H))."""
    k = 1.0 / np.sqrt(n_hidden)
    keys = jax.random.split(key, 11)
    u = lambda kk, shape: jax.random.uniform(kk, shape, jnp.float32, -k, k)
    # LSTM biases are the sum of bias_ih + bias_hh (kept as a single (1, 4H) row).
    b_f = (u(keys[2], (4 * n_hidden,)) + u(keys[3], (4 * n_hidden,))).reshape(1, -1)
    b_b = (u(keys[6], (4 * n_hidden,)) + u(keys[7], (4 * n_hidden,))).reshape(1, -1)
    ke = 1.0 / np.sqrt(2 * n_hidden)
    return {
        "wih_f": u(keys[0], (4 * n_hidden, n_in)),
        "whh_f": u(keys[1], (4 * n_hidden, n_hidden)),
        "b_f": b_f,
        "wih_b": u(keys[4], (4 * n_hidden, n_in)),
        "whh_b": u(keys[5], (4 * n_hidden, n_hidden)),
        "b_b": b_b,
        "wemb": jax.random.uniform(keys[8], (n_out, 2 * n_hidden), jnp.float32, -ke, ke),
        "bemb": jax.random.uniform(keys[9], (1, n_out), jnp.float32, -ke, ke),
    }


def ref_bin_lstm(x, p):
    """Pure-JAX reference with identical semantics (for correctness check)."""
    T, B, _ = x.shape
    H = p["whh_f"].shape[1]

    def run(x_seq, wih, whh, b):
        h = jnp.zeros((B, H), jnp.float32)
        c = jnp.zeros((B, H), jnp.float32)
        hs = []
        for t in range(x_seq.shape[0]):
            gates = x_seq[t] @ wih.T + h @ whh.T + b
            i = jax.nn.sigmoid(gates[:, :H])
            f = jax.nn.sigmoid(gates[:, H:2 * H])
            g = jnp.tanh(gates[:, 2 * H:3 * H])
            o = jax.nn.sigmoid(gates[:, 3 * H:])
            c = f * c + i * g
            h = o * jnp.tanh(c)
            hs.append(h)
        return jnp.stack(hs)

    hf = run(x, p["wih_f"], p["whh_f"], p["b_f"][0])
    hb = run(x[::-1], p["wih_b"], p["whh_b"], p["b_b"][0])[::-1]
    rec = jnp.concatenate([hf, hb], axis=-1)
    out = rec.reshape(T * B, 2 * H) @ p["wemb"].T + p["bemb"][0]
    return out.reshape(T, B, -1)


if __name__ == "__main__":
    T, B, N_IN, N_HIDDEN, N_OUT = 8, 2, 16, 32, 12

    key = jax.random.PRNGKey(0)
    kx, kp = jax.random.split(key)
    x = jax.random.normal(kx, (T, B, N_IN), jnp.float32)
    params = init_params(kp, N_IN, N_HIDDEN, N_OUT)

    out = bin_lstm(x, params)
    out = jax.block_until_ready(out)

    ref = ref_bin_lstm(x, params)
    assert out.shape == (T, B, N_OUT), out.shape
    np.testing.assert_allclose(np.asarray(out), np.asarray(ref), rtol=1e-5, atol=1e-5)

    print("KERNEL_OK")
</pallas_src>

<mosaic_0001>
module attributes {stable_mosaic.version = 11 : i64} {
  func.func @bin_lstm_kernel(%arg0: memref<16x16xf32, #tpu.memory_space<vmem>>, %arg1: memref<16x256xf32, #tpu.memory_space<vmem>>, %arg2: memref<1x256xf32, #tpu.memory_space<vmem>>, %arg3: memref<32x128xf32, #tpu.memory_space<vmem>>, %arg4: memref<32x128xf32, #tpu.memory_space<vmem>>, %arg5: memref<64x12xf32, #tpu.memory_space<vmem>>, %arg6: memref<1x12xf32, #tpu.memory_space<vmem>>, %arg7: memref<16x12xf32, #tpu.memory_space<vmem>>, %arg8: memref<16x256xf32, #tpu.memory_space<vmem>>, %arg9: memref<16x64xf32, #tpu.memory_space<vmem>>) attributes {dimension_semantics = [], scalar_prefetch = 0 : i64, scratch_operands = 2 : i64, tpu.core_type = #tpu.core_type<tc>} {
    %c0 = arith.constant 0 : index
    %c0_0 = arith.constant 0 : index
    %0 = vector.load %arg0[%c0, %c0_0] : memref<16x16xf32, #tpu.memory_space<vmem>>, vector<16x16xf32>
    %c0_1 = arith.constant 0 : index
    %c0_2 = arith.constant 0 : index
    %1 = vector.load %arg1[%c0_1, %c0_2] : memref<16x256xf32, #tpu.memory_space<vmem>>, vector<16x256xf32>
    %cst = arith.constant dense<0.000000e+00> : vector<16x256xf32>
    %2 = tpu.matmul %0, %1, %cst {dimension_numbers = #tpu.dot_dimension_numbers<[1], [0], [0], [1], [0, 0, 1, 1], [], []>} : vector<16x16xf32>, vector<16x256xf32>, vector<16x256xf32> -> vector<16x256xf32>
    %c0_3 = arith.constant 0 : index
    %c0_4 = arith.constant 0 : index
    %3 = vector.load %arg2[%c0_3, %c0_4] : memref<1x256xf32, #tpu.memory_space<vmem>>, vector<1x256xf32>
    %4 = vector.broadcast %3 : vector<1x256xf32> to vector<16x256xf32>
    %5 = arith.addf %2, %4 : vector<16x256xf32>
    %c0_5 = arith.constant 0 : index
    %c0_6 = arith.constant 0 : index
    %6 = vector.load %arg8[%c0_5, %c0_6] : memref<16x256xf32, #tpu.memory_space<vmem>>, vector<16x256xf32>
    tpu.vector_store %arg8[%c0_5, %c0_6], %5 {strides = array<i32>} : memref<16x256xf32, #tpu.memory_space<vmem>>, vector<16x256xf32>,
    %c0_7 = arith.constant 0 : index
    %c0_8 = arith.constant 0 : index
    %7 = vector.load %arg3[%c0_7, %c0_8] : memref<32x128xf32, #tpu.memory_space<vmem>>, vector<32x128xf32>
    %c0_9 = arith.constant 0 : index
    %c0_10 = arith.constant 0 : index
    %8 = vector.load %arg4[%c0_9, %c0_10] : memref<32x128xf32, #tpu.memory_space<vmem>>, vector<32x128xf32>
    %cst_11 = arith.constant 0.000000e+00 : f32
    %9 = vector.broadcast %cst_11 : f32 to vector<2x32xf32>
    %c0_i32 = arith.constant 0 : i32
    %c7_i32 = arith.constant 7 : i32
    %10 = arith.subi %c7_i32, %c0_i32 : i32
    %c2_i32 = arith.constant 2 : i32
    %11 = arith.muli %c0_i32, %c2_i32 : i32
    %12 = arith.index_cast %11 : i32 to index
    %c0_12 = arith.constant 0 : index
    %13 = vector.load %arg8[%12, %c0_12] : memref<16x256xf32, #tpu.memory_space<vmem>>, vector<2x128xf32>
    %cst_13 = arith.constant dense<0.000000e+00> : vector<2x128xf32>
    %14 = tpu.matmul %9, %7, %cst_13 {dimension_numbers = #tpu.dot_dimension_numbers<[1], [0], [0], [1], [0, 0, 1, 1], [], []>} : vector<2x32xf32>, vector<32x128xf32>, vector<2x128xf32> -> vector<2x128xf32>
    %15 = arith.addf %13, %14 : vector<2x128xf32>
    %c2_i32_14 = arith.constant 2 : i32
    %16 = arith.muli %10, %c2_i32_14 : i32
    %17 = arith.index_cast %16 : i32 to index
    %c128 = arith.constant 128 : index
    %18 = vector.load %arg8[%17, %c128] : memref<16x256xf32, #tpu.memory_space<vmem>>, vector<2x128xf32>
    %cst_15 = arith.constant dense<0.000000e+00> : vector<2x128xf32>
    %19 = tpu.matmul %9, %8, %cst_15 {dimension_numbers = #tpu.dot_dimension_numbers<[1], [0], [0], [1], [0, 0, 1, 1], [], []>} : vector<2x32xf32>, vector<32x128xf32>, vector<2x128xf32> -> vector<2x128xf32>
    %20 = arith.addf %18, %19 : vector<2x128xf32>
    %21 = arith.negf %15 : vector<2x128xf32>
    %22 = math.exp %21 : vector<2x128xf32>
    %cst_16 = arith.constant 1.000000e+00 : f32
    %23 = vector.broadcast %cst_16 : f32 to vector<2x128xf32>
    %24 = arith.addf %23, %22 : vector<2x128xf32>
    %25 = arith.divf %23, %24 : vector<2x128xf32>
    %26 = arith.negf %20 : vector<2x128xf32>
    %27 = math.exp %26 : vector<2x128xf32>
    %cst_17 = arith.constant 1.000000e+00 : f32
    %28 = vector.broadcast %cst_17 : f32 to vector<2x128xf32>
    %29 = arith.addf %28, %27 : vector<2x128xf32>
    %30 = arith.divf %28, %29 : vector<2x128xf32>
    %31 = vector.extract_strided_slice %25 {offsets = [0, 32], sizes = [2, 32], strides = [1, 1]} : vector<2x128xf32> to vector<2x32xf32>
    %32 = arith.mulf %31, %9 : vector<2x32xf32>
    %33 = vector.extract_strided_slice %25 {offsets = [0, 0], sizes = [2, 32], strides = [1, 1]} : vector<2x128xf32> to vector<2x32xf32>
    %34 = vector.extract_strided_slice %15 {offsets = [0, 64], sizes = [2, 32], strides = [1, 1]} : vector<2x128xf32> to vector<2x32xf32>
    %35 = math.tanh %34 : vector<2x32xf32>
    %36 = arith.mulf %33, %35 : vector<2x32xf32>
    %37 = arith.addf %32, %36 : vector<2x32xf32>
    %38 = vector.extract_strided_slice %30 {offsets = [0, 32], sizes = [2, 32], strides = [1, 1]} : vector<2x128xf32> to vector<2x32xf32>
    %39 = arith.mulf %38, %9 : vector<2x32xf32>
    %40 = vector.extract_strided_slice %30 {offsets = [0, 0], sizes = [2, 32], strides = [1, 1]} : vector<2x128xf32> to vector<2x32xf32>
    %41 = vector.extract_strided_slice %20 {offsets = [0, 64], sizes = [2, 32], strides = [1, 1]} : vector<2x128xf32> to vector<2x32xf32>
    %42 = math.tanh %41 : vector<2x32xf32>
    %43 = arith.mulf %40, %42 : vector<2x32xf32>
    %44 = arith.addf %39, %43 : vector<2x32xf32>
    %45 = vector.extract_strided_slice %25 {offsets = [0, 96], sizes = [2, 32], strides = [1, 1]} : vector<2x128xf32> to vector<2x32xf32>
    %46 = math.tanh %37 : vector<2x32xf32>
    %47 = arith.mulf %45, %46 : vector<2x32xf32>
    %48 = vector.extract_strided_slice %30 {offsets = [0, 96], sizes = [2, 32], strides = [1, 1]} : vector<2x128xf32> to vector<2x32xf32>
    %49 = math.tanh %44 : vector<2x32xf32>
    %50 = arith.mulf %48, %49 : vector<2x32xf32>
    %c2_i32_18 = arith.constant 2 : i32
    %51 = arith.muli %c0_i32, %c2_i32_18 : i32
    %52 = arith.index_cast %51 : i32 to index
    %c0_19 = arith.constant 0 : index
    %53 = vector.load %arg9[%52, %c0_19] : memref<16x64xf32, #tpu.memory_space<vmem>>, vector<2x32xf32>
    tpu.vector_store %arg9[%52, %c0_19], %47 {strides = array<i32>} : memref<16x64xf32, #tpu.memory_space<vmem>>, vector<2x32xf32>,
    %c2_i32_20 = arith.constant 2 : i32
    %54 = arith.muli %10, %c2_i32_20 : i32
    %55 = arith.index_cast %54 : i32 to index
    %c32 = arith.constant 32 : index
    %56 = vector.load %arg9[%55, %c32] : memref<16x64xf32, #tpu.memory_space<vmem>>, vector<2x32xf32>
    tpu.vector_store %arg9[%55, %c32], %50 {strides = array<i32>} : memref<16x64xf32, #tpu.memory_space<vmem>>, vector<2x32xf32>,
    %c1_i32 = arith.constant 1 : i32
    %c7_i32_21 = arith.constant 7 : i32
    %57 = arith.subi %c7_i32_21, %c1_i32 : i32
    %c2_i32_22 = arith.constant 2 : i32
    %58 = arith.muli %c1_i32, %c2_i32_22 : i32
    %59 = arith.index_cast %58 : i32 to index
    %c0_23 = arith.constant 0 : index
    %60 = vector.load %arg8[%59, %c0_23] : memref<16x256xf32, #tpu.memory_space<vmem>>, vector<2x128xf32>
    %cst_24 = arith.constant dense<0.000000e+00> : vector<2x128xf32>
    %61 = tpu.matmul %47, %7, %cst_24 {dimension_numbers = #tpu.dot_dimension_numbers<[1], [0], [0], [1], [0, 0, 1, 1], [], []>} : vector<2x32xf32>, vector<32x128xf32>, vector<2x128xf32> -> vector<2x128xf32>
    %62 = arith.addf %60, %61 : vector<2x128xf32>
    %c2_i32_25 = arith.constant 2 : i32
    %63 = arith.muli %57, %c2_i32_25 : i32
    %64 = arith.index_cast %63 : i32 to index
    %c128_26 = arith.constant 128 : index
    %65 = vector.load %arg8[%64, %c128_26] : memref<16x256xf32, #tpu.memory_space<vmem>>, vector<2x128xf32>
    %cst_27 = arith.constant dense<0.000000e+00> : vector<2x128xf32>
    %66 = tpu.matmul %50, %8, %cst_27 {dimension_numbers = #tpu.dot_dimension_numbers<[1], [0], [0], [1], [0, 0, 1, 1], [], []>} : vector<2x32xf32>, vector<32x128xf32>, vector<2x128xf32> -> vector<2x128xf32>
    %67 = arith.addf %65, %66 : vector<2x128xf32>
    %68 = arith.negf %62 : vector<2x128xf32>
    %69 = math.exp %68 : vector<2x128xf32>
    %cst_28 = arith.constant 1.000000e+00 : f32
    %70 = vector.broadcast %cst_28 : f32 to vector<2x128xf32>
    %71 = arith.addf %70, %69 : vector<2x128xf32>
    %72 = arith.divf %70, %71 : vector<2x128xf32>
    %73 = arith.negf %67 : vector<2x128xf32>
    %74 = math.exp %73 : vector<2x128xf32>
    %cst_29 = arith.constant 1.000000e+00 : f32
    %75 = vector.broadcast %cst_29 : f32 to vector<2x128xf32>
    %76 = arith.addf %75, %74 : vector<2x128xf32>
    %77 = arith.divf %75, %76 : vector<2x128xf32>
    %78 = vector.extract_strided_slice %72 {offsets = [0, 32], sizes = [2, 32], strides = [1, 1]} : vector<2x128xf32> to vector<2x32xf32>
    %79 = arith.mulf %78, %37 : vector<2x32xf32>
    %80 = vector.extract_strided_slice %72 {offsets = [0, 0], sizes = [2, 32], strides = [1, 1]} : vector<2x128xf32> to vector<2x32xf32>
    %81 = vector.extract_strided_slice %62 {offsets = [0, 64], sizes = [2, 32], strides = [1, 1]} : vector<2x128xf32> to vector<2x32xf32>
    %82 = math.tanh %81 : vector<2x32xf32>
    %83 = arith.mulf %80, %82 : vector<2x32xf32>
    %84 = arith.addf %79, %83 : vector<2x32xf32>
    %85 = vector.extract_strided_slice %77 {offsets = [0, 32], sizes = [2, 32], strides = [1, 1]} : vector<2x128xf32> to vector<2x32xf32>
    %86 = arith.mulf %85, %44 : vector<2x32xf32>
    %87 = vector.extract_strided_slice %77 {offsets = [0, 0], sizes = [2, 32], strides = [1, 1]} : vector<2x128xf32> to vector<2x32xf32>
    %88 = vector.extract_strided_slice %67 {offsets = [0, 64], sizes = [2, 32], strides = [1, 1]} : vector<2x128xf32> to vector<2x32xf32>
    %89 = math.tanh %88 : vector<2x32xf32>
    %90 = arith.mulf %87, %89 : vector<2x32xf32>
    %91 = arith.addf %86, %90 : vector<2x32xf32>
    %92 = vector.extract_strided_slice %72 {offsets = [0, 96], sizes = [2, 32], strides = [1, 1]} : vector<2x128xf32> to vector<2x32xf32>
    %93 = math.tanh %84 : vector<2x32xf32>
    %94 = arith.mulf %92, %93 : vector<2x32xf32>
    %95 = vector.extract_strided_slice %77 {offsets = [0, 96], sizes = [2, 32], strides = [1, 1]} : vector<2x128xf32> to vector<2x32xf32>
    %96 = math.tanh %91 : vector<2x32xf32>
    %97 = arith.mulf %95, %96 : vector<2x32xf32>
    %c2_i32_30 = arith.constant 2 : i32
    %98 = arith.muli %c1_i32, %c2_i32_30 : i32
    %99 = arith.index_cast %98 : i32 to index
    %c0_31 = arith.constant 0 : index
    %100 = vector.load %arg9[%99, %c0_31] : memref<16x64xf32, #tpu.memory_space<vmem>>, vector<2x32xf32>
    tpu.vector_store %arg9[%99, %c0_31], %94 {strides = array<i32>} : memref<16x64xf32, #tpu.memory_space<vmem>>, vector<2x32xf32>,
    %c2_i32_32 = arith.constant 2 : i32
    %101 = arith.muli %57, %c2_i32_32 : i32
    %102 = arith.index_cast %101 : i32 to index
    %c32_33 = arith.constant 32 : index
    %103 = vector.load %arg9[%102, %c32_33] : memref<16x64xf32, #tpu.memory_space<vmem>>, vector<2x32xf32>
    tpu.vector_store %arg9[%102, %c32_33], %97 {strides = array<i32>} : memref<16x64xf32, #tpu.memory_space<vmem>>, vector<2x32xf32>,
    %c2_i32_34 = arith.constant 2 : i32
    %c7_i32_35 = arith.constant 7 : i32
    %104 = arith.subi %c7_i32_35, %c2_i32_34 : i32
    %c2_i32_36 = arith.constant 2 : i32
    %105 = arith.muli %c2_i32_34, %c2_i32_36 : i32
    %106 = arith.index_cast %105 : i32 to index
    %c0_37 = arith.constant 0 : index
    %107 = vector.load %arg8[%106, %c0_37] : memref<16x256xf32, #tpu.memory_space<vmem>>, vector<2x128xf32>
    %cst_38 = arith.constant dense<0.000000e+00> : vector<2x128xf32>
    %108 = tpu.matmul %94, %7, %cst_38 {dimension_numbers = #tpu.dot_dimension_numbers<[1], [0], [0], [1], [0, 0, 1, 1], [], []>} : vector<2x32xf32>, vector<32x128xf32>, vector<2x128xf32> -> vector<2x128xf32>
    %109 = arith.addf %107, %108 : vector<2x128xf32>
    %c2_i32_39 = arith.constant 2 : i32
    %110 = arith.muli %104, %c2_i32_39 : i32
    %111 = arith.index_cast %110 : i32 to index
    %c128_40 = arith.constant 128 : index
    %112 = vector.load %arg8[%111, %c128_40] : memref<16x256xf32, #tpu.memory_space<vmem>>, vector<2x128xf32>
    %cst_41 = arith.constant dense<0.000000e+00> : vector<2x128xf32>
    %113 = tpu.matmul %97, %8, %cst_41 {dimension_numbers = #tpu.dot_dimension_numbers<[1], [0], [0], [1], [0, 0, 1, 1], [], []>} : vector<2x32xf32>, vector<32x128xf32>, vector<2x128xf32> -> vector<2x128xf32>
    %114 = arith.addf %112, %113 : vector<2x128xf32>
    %115 = arith.negf %109 : vector<2x128xf32>
    %116 = math.exp %115 : vector<2x128xf32>
    %cst_42 = arith.constant 1.000000e+00 : f32
    %117 = vector.broadcast %cst_42 : f32 to vector<2x128xf32>
    %118 = arith.addf %117, %116 : vector<2x128xf32>
    %119 = arith.divf %117, %118 : vector<2x128xf32>
    %120 = arith.negf %114 : vector<2x128xf32>
    %121 = math.exp %120 : vector<2x128xf32>
    %cst_43 = arith.constant 1.000000e+00 : f32
    %122 = vector.broadcast %cst_43 : f32 to vector<2x128xf32>
    %123 = arith.addf %122, %121 : vector<2x128xf32>
    %124 = arith.divf %122, %123 : vector<2x128xf32>
    %125 = vector.extract_strided_slice %119 {offsets = [0, 32], sizes = [2, 32], strides = [1, 1]} : vector<2x128xf32> to vector<2x32xf32>
    %126 = arith.mulf %125, %84 : vector<2x32xf32>
    %127 = vector.extract_strided_slice %119 {offsets = [0, 0], sizes = [2, 32], strides = [1, 1]} : vector<2x128xf32> to vector<2x32xf32>
    %128 = vector.extract_strided_slice %109 {offsets = [0, 64], sizes = [2, 32], strides = [1, 1]} : vector<2x128xf32> to vector<2x32xf32>
    %129 = math.tanh %128 : vector<2x32xf32>
    %130 = arith.mulf %127, %129 : vector<2x32xf32>
    %131 = arith.addf %126, %130 : vector<2x32xf32>
    %132 = vector.extract_strided_slice %124 {offsets = [0, 32], sizes = [2, 32], strides = [1, 1]} : vector<2x128xf32> to vector<2x32xf32>
    %133 = arith.mulf %132, %91 : vector<2x32xf32>
    %134 = vector.extract_strided_slice %124 {offsets = [0, 0], sizes = [2, 32], strides = [1, 1]} : vector<2x128xf32> to vector<2x32xf32>
    %135 = vector.extract_strided_slice %114 {offsets = [0, 64], sizes = [2, 32], strides = [1, 1]} : vector<2x128xf32> to vector<2x32xf32>
    %136 = math.tanh %135 : vector<2x32xf32>
    %137 = arith.mulf %134, %136 : vector<2x32xf32>
    %138 = arith.addf %133, %137 : vector<2x32xf32>
    %139 = vector.extract_strided_slice %119 {offsets = [0, 96], sizes = [2, 32], strides = [1, 1]} : vector<2x128xf32> to vector<2x32xf32>
    %140 = math.tanh %131 : vector<2x32xf32>
    %141 = arith.mulf %139, %140 : vector<2x32xf32>
    %142 = vector.extract_strided_slice %124 {offsets = [0, 96], sizes = [2, 32], strides = [1, 1]} : vector<2x128xf32> to vector<2x32xf32>
    %143 = math.tanh %138 : vector<2x32xf32>
    %144 = arith.mulf %142, %143 : vector<2x32xf32>
    %c2_i32_44 = arith.constant 2 : i32
    %145 = arith.muli %c2_i32_34, %c2_i32_44 : i32
    %146 = arith.index_cast %145 : i32 to index
    %c0_45 = arith.constant 0 : index
    %147 = vector.load %arg9[%146, %c0_45] : memref<16x64xf32, #tpu.memory_space<vmem>>, vector<2x32xf32>
    tpu.vector_store %arg9[%146, %c0_45], %141 {strides = array<i32>} : memref<16x64xf32, #tpu.memory_space<vmem>>, vector<2x32xf32>,
    %c2_i32_46 = arith.constant 2 : i32
    %148 = arith.muli %104, %c2_i32_46 : i32
    %149 = arith.index_cast %148 : i32 to index
    %c32_47 = arith.constant 32 : index
    %150 = vector.load %arg9[%149, %c32_47] : memref<16x64xf32, #tpu.memory_space<vmem>>, vector<2x32xf32>
    tpu.vector_store %arg9[%149, %c32_47], %144 {strides = array<i32>} : memref<16x64xf32, #tpu.memory_space<vmem>>, vector<2x32xf32>,
    %c3_i32 = arith.constant 3 : i32
    %c7_i32_48 = arith.constant 7 : i32
    %151 = arith.subi %c7_i32_48, %c3_i32 : i32
    %c2_i32_49 = arith.constant 2 : i32
    %152 = arith.muli %c3_i32, %c2_i32_49 : i32
    %153 = arith.index_cast %152 : i32 to index
    %c0_50 = arith.constant 0 : index
    %154 = vector.load %arg8[%153, %c0_50] : memref<16x256xf32, #tpu.memory_space<vmem>>, vector<2x128xf32>
    %cst_51 = arith.constant dense<0.000000e+00> : vector<2x128xf32>
    %155 = tpu.matmul %141, %7, %cst_51 {dimension_numbers = #tpu.dot_dimension_numbers<[1], [0], [0], [1], [0, 0, 1, 1], [], []>} : vector<2x32xf32>, vector<32x128xf32>, vector<2x128xf32> -> vector<2x128xf32>
    %156 = arith.addf %154, %155 : vector<2x128xf32>
    %c2_i32_52 = arith.constant 2 : i32
    %157 = arith.muli %151, %c2_i32_52 : i32
    %158 = arith.index_cast %157 : i32 to index
    %c128_53 = arith.constant 128 : index
    %159 = vector.load %arg8[%158, %c128_53] : memref<16x256xf32, #tpu.memory_space<vmem>>, vector<2x128xf32>
    %cst_54 = arith.constant dense<0.000000e+00> : vector<2x128xf32>
    %160 = tpu.matmul %144, %8, %cst_54 {dimension_numbers = #tpu.dot_dimension_numbers<[1], [0], [0], [1], [0, 0, 1, 1], [], []>} : vector<2x32xf32>, vector<32x128xf32>, vector<2x128xf32> -> vector<2x128xf32>
    %161 = arith.addf %159, %160 : vector<2x128xf32>
    %162 = arith.negf %156 : vector<2x128xf32>
    %163 = math.exp %162 : vector<2x128xf32>
    %cst_55 = arith.constant 1.000000e+00 : f32
    %164 = vector.broadcast %cst_55 : f32 to vector<2x128xf32>
    %165 = arith.addf %164, %163 : vector<2x128xf32>
    %166 = arith.divf %164, %165 : vector<2x128xf32>
    %167 = arith.negf %161 : vector<2x128xf32>
    %168 = math.exp %167 : vector<2x128xf32>
    %cst_56 = arith.constant 1.000000e+00 : f32
    %169 = vector.broadcast %cst_56 : f32 to vector<2x128xf32>
    %170 = arith.addf %169, %168 : vector<2x128xf32>
    %171 = arith.divf %169, %170 : vector<2x128xf32>
    %172 = vector.extract_strided_slice %166 {offsets = [0, 32], sizes = [2, 32], strides = [1, 1]} : vector<2x128xf32> to vector<2x32xf32>
    %173 = arith.mulf %172, %131 : vector<2x32xf32>
    %174 = vector.extract_strided_slice %166 {offsets = [0, 0], sizes = [2, 32], strides = [1, 1]} : vector<2x128xf32> to vector<2x32xf32>
    %175 = vector.extract_strided_slice %156 {offsets = [0, 64], sizes = [2, 32], strides = [1, 1]} : vector<2x128xf32> to vector<2x32xf32>
    %176 = math.tanh %175 : vector<2x32xf32>
    %177 = arith.mulf %174, %176 : vector<2x32xf32>
    %178 = arith.addf %173, %177 : vector<2x32xf32>
    %179 = vector.extract_strided_slice %171 {offsets = [0, 32], sizes = [2, 32], strides = [1, 1]} : vector<2x128xf32> to vector<2x32xf32>
    %180 = arith.mulf %179, %138 : vector<2x32xf32>
    %181 = vector.extract_strided_slice %171 {offsets = [0, 0], sizes = [2, 32], strides = [1, 1]} : vector<2x128xf32> to vector<2x32xf32>
    %182 = vector.extract_strided_slice %161 {offsets = [0, 64], sizes = [2, 32], strides = [1, 1]} : vector<2x128xf32> to vector<2x32xf32>
    %183 = math.tanh %182 : vector<2x32xf32>
    %184 = arith.mulf %181, %183 : vector<2x32xf32>
    %185 = arith.addf %180, %184 : vector<2x32xf32>
    %186 = vector.extract_strided_slice %166 {offsets = [0, 96], sizes = [2, 32], strides = [1, 1]} : vector<2x128xf32> to vector<2x32xf32>
    %187 = math.tanh %178 : vector<2x32xf32>
    %188 = arith.mulf %186, %187 : vector<2x32xf32>
    %189 = vector.extract_strided_slice %171 {offsets = [0, 96], sizes = [2, 32], strides = [1, 1]} : vector<2x128xf32> to vector<2x32xf32>
    %190 = math.tanh %185 : vector<2x32xf32>
    %191 = arith.mulf %189, %190 : vector<2x32xf32>
    %c2_i32_57 = arith.constant 2 : i32
    %192 = arith.muli %c3_i32, %c2_i32_57 : i32
    %193 = arith.index_cast %192 : i32 to index
    %c0_58 = arith.constant 0 : index
    %194 = vector.load %arg9[%193, %c0_58] : memref<16x64xf32, #tpu.memory_space<vmem>>, vector<2x32xf32>
    tpu.vector_store %arg9[%193, %c0_58], %188 {strides = array<i32>} : memref<16x64xf32, #tpu.memory_space<vmem>>, vector<2x32xf32>,
    %c2_i32_59 = arith.constant 2 : i32
    %195 = arith.muli %151, %c2_i32_59 : i32
    %196 = arith.index_cast %195 : i32 to index
    %c32_60 = arith.constant 32 : index
    %197 = vector.load %arg9[%196, %c32_60] : memref<16x64xf32, #tpu.memory_space<vmem>>, vector<2x32xf32>
    tpu.vector_store %arg9[%196, %c32_60], %191 {strides = array<i32>} : memref<16x64xf32, #tpu.memory_space<vmem>>, vector<2x32xf32>,
    %c4_i32 = arith.constant 4 : i32
    %c7_i32_61 = arith.constant 7 : i32
    %198 = arith.subi %c7_i32_61, %c4_i32 : i32
    %c2_i32_62 = arith.constant 2 : i32
    %199 = arith.muli %c4_i32, %c2_i32_62 : i32
    %200 = arith.index_cast %199 : i32 to index
    %c0_63 = arith.constant 0 : index
    %201 = vector.load %arg8[%200, %c0_63] : memref<16x256xf32, #tpu.memory_space<vmem>>, vector<2x128xf32>
    %cst_64 = arith.constant dense<0.000000e+00> : vector<2x128xf32>
    %202 = tpu.matmul %188, %7, %cst_64 {dimension_numbers = #tpu.dot_dimension_numbers<[1], [0], [0], [1], [0, 0, 1, 1], [], []>} : vector<2x32xf32>, vector<32x128xf32>, vector<2x128xf32> -> vector<2x128xf32>
    %203 = arith.addf %201, %202 : vector<2x128xf32>
    %c2_i32_65 = arith.constant 2 : i32
    %204 = arith.muli %198, %c2_i32_65 : i32
    %205 = arith.index_cast %204 : i32 to index
    %c128_66 = arith.constant 128 : index
    %206 = vector.load %arg8[%205, %c128_66] : memref<16x256xf32, #tpu.memory_space<vmem>>, vector<2x128xf32>
    %cst_67 = arith.constant dense<0.000000e+00> : vector<2x128xf32>
    %207 = tpu.matmul %191, %8, %cst_67 {dimension_numbers = #tpu.dot_dimension_numbers<[1], [0], [0], [1], [0, 0, 1, 1], [], []>} : vector<2x32xf32>, vector<32x128xf32>, vector<2x128xf32> -> vector<2x128xf32>
    %208 = arith.addf %206, %207 : vector<2x128xf32>
    %209 = arith.negf %203 : vector<2x128xf32>
    %210 = math.exp %209 : vector<2x128xf32>
    %cst_68 = arith.constant 1.000000e+00 : f32
    %211 = vector.broadcast %cst_68 : f32 to vector<2x128xf32>
    %212 = arith.addf %211, %210 : vector<2x128xf32>
    %213 = arith.divf %211, %212 : vector<2x128xf32>
    %214 = arith.negf %208 : vector<2x128xf32>
    %215 = math.exp %214 : vector<2x128xf32>
    %cst_69 = arith.constant 1.000000e+00 : f32
    %216 = vector.broadcast %cst_69 : f32 to vector<2x128xf32>
    %217 = arith.addf %216, %215 : vector<2x128xf32>
    %218 = arith.divf %216, %217 : vector<2x128xf32>
    %219 = vector.extract_strided_slice %213 {offsets = [0, 32], sizes = [2, 32], strides = [1, 1]} : vector<2x128xf32> to vector<2x32xf32>
    %220 = arith.mulf %219, %178 : vector<2x32xf32>
    %221 = vector.extract_strided_slice %213 {offsets = [0, 0], sizes = [2, 32], strides = [1, 1]} : vector<2x128xf32> to vector<2x32xf32>
    %222 = vector.extract_strided_slice %203 {offsets = [0, 64], sizes = [2, 32], strides = [1, 1]} : vector<2x128xf32> to vector<2x32xf32>
    %223 = math.tanh %222 : vector<2x32xf32>
    %224 = arith.mulf %221, %223 : vector<2x32xf32>
    %225 = arith.addf %220, %224 : vector<2x32xf32>
    %226 = vector.extract_strided_slice %218 {offsets = [0, 32], sizes = [2, 32], strides = [1, 1]} : vector<2x128xf32> to vector<2x32xf32>
    %227 = arith.mulf %226, %185 : vector<2x32xf32>
    %228 = vector.extract_strided_slice %218 {offsets = [0, 0], sizes = [2, 32], strides = [1, 1]} : vector<2x128xf32> to vector<2x32xf32>
    %229 = vector.extract_strided_slice %208 {offsets = [0, 64], sizes = [2, 32], strides = [1, 1]} : vector<2x128xf32> to vector<2x32xf32>
    %230 = math.tanh %229 : vector<2x32xf32>
    %231 = arith.mulf %228, %230 : vector<2x32xf32>
    %232 = arith.addf %227, %231 : vector<2x32xf32>
    %233 = vector.extract_strided_slice %213 {offsets = [0, 96], sizes = [2, 32], strides = [1, 1]} : vector<2x128xf32> to vector<2x32xf32>
    %234 = math.tanh %225 : vector<2x32xf32>
    %235 = arith.mulf %233, %234 : vector<2x32xf32>
    %236 = vector.extract_strided_slice %218 {offsets = [0, 96], sizes = [2, 32], strides = [1, 1]} : vector<2x128xf32> to vector<2x32xf32>
    %237 = math.tanh %232 : vector<2x32xf32>
    %238 = arith.mulf %236, %237 : vector<2x32xf32>
    %c2_i32_70 = arith.constant 2 : i32
    %239 = arith.muli %c4_i32, %c2_i32_70 : i32
    %240 = arith.index_cast %239 : i32 to index
    %c0_71 = arith.constant 0 : index
    %241 = vector.load %arg9[%240, %c0_71] : memref<16x64xf32, #tpu.memory_space<vmem>>, vector<2x32xf32>
    tpu.vector_store %arg9[%240, %c0_71], %235 {strides = array<i32>} : memref<16x64xf32, #tpu.memory_space<vmem>>, vector<2x32xf32>,
    %c2_i32_72 = arith.constant 2 : i32
    %242 = arith.muli %198, %c2_i32_72 : i32
    %243 = arith.index_cast %242 : i32 to index
    %c32_73 = arith.constant 32 : index
    %244 = vector.load %arg9[%243, %c32_73] : memref<16x64xf32, #tpu.memory_space<vmem>>, vector<2x32xf32>
    tpu.vector_store %arg9[%243, %c32_73], %238 {strides = array<i32>} : memref<16x64xf32, #tpu.memory_space<vmem>>, vector<2x32xf32>,
    %c5_i32 = arith.constant 5 : i32
    %c7_i32_74 = arith.constant 7 : i32
    %245 = arith.subi %c7_i32_74, %c5_i32 : i32
    %c2_i32_75 = arith.constant 2 : i32
    %246 = arith.muli %c5_i32, %c2_i32_75 : i32
    %247 = arith.index_cast %246 : i32 to index
    %c0_76 = arith.constant 0 : index
    %248 = vector.load %arg8[%247, %c0_76] : memref<16x256xf32, #tpu.memory_space<vmem>>, vector<2x128xf32>
    %cst_77 = arith.constant dense<0.000000e+00> : vector<2x128xf32>
    %249 = tpu.matmul %235, %7, %cst_77 {dimension_numbers = #tpu.dot_dimension_numbers<[1], [0], [0], [1], [0, 0, 1, 1], [], []>} : vector<2x32xf32>, vector<32x128xf32>, vector<2x128xf32> -> vector<2x128xf32>
    %250 = arith.addf %248, %249 : vector<2x128xf32>
    %c2_i32_78 = arith.constant 2 : i32
    %251 = arith.muli %245, %c2_i32_78 : i32
    %252 = arith.index_cast %251 : i32 to index
    %c128_79 = arith.constant 128 : index
    %253 = vector.load %arg8[%252, %c128_79] : memref<16x256xf32, #tpu.memory_space<vmem>>, vector<2x128xf32>
    %cst_80 = arith.constant dense<0.000000e+00> : vector<2x128xf32>
    %254 = tpu.matmul %238, %8, %cst_80 {dimension_numbers = #tpu.dot_dimension_numbers<[1], [0], [0], [1], [0, 0, 1, 1], [], []>} : vector<2x32xf32>, vector<32x128xf32>, vector<2x128xf32> -> vector<2x128xf32>
    %255 = arith.addf %253, %254 : vector<2x128xf32>
    %256 = arith.negf %250 : vector<2x128xf32>
    %257 = math.exp %256 : vector<2x128xf32>
    %cst_81 = arith.constant 1.000000e+00 : f32
    %258 = vector.broadcast %cst_81 : f32 to vector<2x128xf32>
    %259 = arith.addf %258, %257 : vector<2x128xf32>
    %260 = arith.divf %258, %259 : vector<2x128xf32>
    %261 = arith.negf %255 : vector<2x128xf32>
    %262 = math.exp %261 : vector<2x128xf32>
    %cst_82 = arith.constant 1.000000e+00 : f32
    %263 = vector.broadcast %cst_82 : f32 to vector<2x128xf32>
    %264 = arith.addf %263, %262 : vector<2x128xf32>
    %265 = arith.divf %263, %264 : vector<2x128xf32>
    %266 = vector.extract_strided_slice %260 {offsets = [0, 32], sizes = [2, 32], strides = [1, 1]} : vector<2x128xf32> to vector<2x32xf32>
    %267 = arith.mulf %266, %225 : vector<2x32xf32>
    %268 = vector.extract_strided_slice %260 {offsets = [0, 0], sizes = [2, 32], strides = [1, 1]} : vector<2x128xf32> to vector<2x32xf32>
    %269 = vector.extract_strided_slice %250 {offsets = [0, 64], sizes = [2, 32], strides = [1, 1]} : vector<2x128xf32> to vector<2x32xf32>
    %270 = math.tanh %269 : vector<2x32xf32>
    %271 = arith.mulf %268, %270 : vector<2x32xf32>
    %272 = arith.addf %267, %271 : vector<2x32xf32>
    %273 = vector.extract_strided_slice %265 {offsets = [0, 32], sizes = [2, 32], strides = [1, 1]} : vector<2x128xf32> to vector<2x32xf32>
    %274 = arith.mulf %273, %232 : vector<2x32xf32>
    %275 = vector.extract_strided_slice %265 {offsets = [0, 0], sizes = [2, 32], strides = [1, 1]} : vector<2x128xf32> to vector<2x32xf32>
    %276 = vector.extract_strided_slice %255 {offsets = [0, 64], sizes = [2, 32], strides = [1, 1]} : vector<2x128xf32> to vector<2x32xf32>
    %277 = math.tanh %276 : vector<2x32xf32>
    %278 = arith.mulf %275, %277 : vector<2x32xf32>
    %279 = arith.addf %274, %278 : vector<2x32xf32>
    %280 = vector.extract_strided_slice %260 {offsets = [0, 96], sizes = [2, 32], strides = [1, 1]} : vector<2x128xf32> to vector<2x32xf32>
    %281 = math.tanh %272 : vector<2x32xf32>
    %282 = arith.mulf %280, %281 : vector<2x32xf32>
    %283 = vector.extract_strided_slice %265 {offsets = [0, 96], sizes = [2, 32], strides = [1, 1]} : vector<2x128xf32> to vector<2x32xf32>
    %284 = math.tanh %279 : vector<2x32xf32>
    %285 = arith.mulf %283, %284 : vector<2x32xf32>
    %c2_i32_83 = arith.constant 2 : i32
    %286 = arith.muli %c5_i32, %c2_i32_83 : i32
    %287 = arith.index_cast %286 : i32 to index
    %c0_84 = arith.constant 0 : index
    %288 = vector.load %arg9[%287, %c0_84] : memref<16x64xf32, #tpu.memory_space<vmem>>, vector<2x32xf32>
    tpu.vector_store %arg9[%287, %c0_84], %282 {strides = array<i32>} : memref<16x64xf32, #tpu.memory_space<vmem>>, vector<2x32xf32>,
    %c2_i32_85 = arith.constant 2 : i32
    %289 = arith.muli %245, %c2_i32_85 : i32
    %290 = arith.index_cast %289 : i32 to index
    %c32_86 = arith.constant 32 : index
    %291 = vector.load %arg9[%290, %c32_86] : memref<16x64xf32, #tpu.memory_space<vmem>>, vector<2x32xf32>
    tpu.vector_store %arg9[%290, %c32_86], %285 {strides = array<i32>} : memref<16x64xf32, #tpu.memory_space<vmem>>, vector<2x32xf32>,
    %c6_i32 = arith.constant 6 : i32
    %c7_i32_87 = arith.constant 7 : i32
    %292 = arith.subi %c7_i32_87, %c6_i32 : i32
    %c2_i32_88 = arith.constant 2 : i32
    %293 = arith.muli %c6_i32, %c2_i32_88 : i32
    %294 = arith.index_cast %293 : i32 to index
    %c0_89 = arith.constant 0 : index
    %295 = vector.load %arg8[%294, %c0_89] : memref<16x256xf32, #tpu.memory_space<vmem>>, vector<2x128xf32>
    %cst_90 = arith.constant dense<0.000000e+00> : vector<2x128xf32>
    %296 = tpu.matmul %282, %7, %cst_90 {dimension_numbers = #tpu.dot_dimension_numbers<[1], [0], [0], [1], [0, 0, 1, 1], [], []>} : vector<2x32xf32>, vector<32x128xf32>, vector<2x128xf32> -> vector<2x128xf32>
    %297 = arith.addf %295, %296 : vector<2x128xf32>
    %c2_i32_91 = arith.constant 2 : i32
    %298 = arith.muli %292, %c2_i32_91 : i32
    %299 = arith.index_cast %298 : i32 to index
    %c128_92 = arith.constant 128 : index
    %300 = vector.load %arg8[%299, %c128_92] : memref<16x256xf32, #tpu.memory_space<vmem>>, vector<2x128xf32>
    %cst_93 = arith.constant dense<0.000000e+00> : vector<2x128xf32>
    %301 = tpu.matmul %285, %8, %cst_93 {dimension_numbers = #tpu.dot_dimension_numbers<[1], [0], [0], [1], [0, 0, 1, 1], [], []>} : vector<2x32xf32>, vector<32x128xf32>, vector<2x128xf32> -> vector<2x128xf32>
    %302 = arith.addf %300, %301 : vector<2x128xf32>
    %303 = arith.negf %297 : vector<2x128xf32>
    %304 = math.exp %303 : vector<2x128xf32>
    %cst_94 = arith.constant 1.000000e+00 : f32
    %305 = vector.broadcast %cst_94 : f32 to vector<2x128xf32>
    %306 = arith.addf %305, %304 : vector<2x128xf32>
    %307 = arith.divf %305, %306 : vector<2x128xf32>
    %308 = arith.negf %302 : vector<2x128xf32>
    %309 = math.exp %308 : vector<2x128xf32>
    %cst_95 = arith.constant 1.000000e+00 : f32
    %310 = vector.broadcast %cst_95 : f32 to vector<2x128xf32>
    %311 = arith.addf %310, %309 : vector<2x128xf32>
    %312 = arith.divf %310, %311 : vector<2x128xf32>
    %313 = vector.extract_strided_slice %307 {offsets = [0, 32], sizes = [2, 32], strides = [1, 1]} : vector<2x128xf32> to vector<2x32xf32>
    %314 = arith.mulf %313, %272 : vector<2x32xf32>
    %315 = vector.extract_strided_slice %307 {offsets = [0, 0], sizes = [2, 32], strides = [1, 1]} : vector<2x128xf32> to vector<2x32xf32>
    %316 = vector.extract_strided_slice %297 {offsets = [0, 64], sizes = [2, 32], strides = [1, 1]} : vector<2x128xf32> to vector<2x32xf32>
    %317 = math.tanh %316 : vector<2x32xf32>
    %318 = arith.mulf %315, %317 : vector<2x32xf32>
    %319 = arith.addf %314, %318 : vector<2x32xf32>
    %320 = vector.extract_strided_slice %312 {offsets = [0, 32], sizes = [2, 32], strides = [1, 1]} : vector<2x128xf32> to vector<2x32xf32>
    %321 = arith.mulf %320, %279 : vector<2x32xf32>
    %322 = vector.extract_strided_slice %312 {offsets = [0, 0], sizes = [2, 32], strides = [1, 1]} : vector<2x128xf32> to vector<2x32xf32>
    %323 = vector.extract_strided_slice %302 {offsets = [0, 64], sizes = [2, 32], strides = [1, 1]} : vector<2x128xf32> to vector<2x32xf32>
    %324 = math.tanh %323 : vector<2x32xf32>
    %325 = arith.mulf %322, %324 : vector<2x32xf32>
    %326 = arith.addf %321, %325 : vector<2x32xf32>
    %327 = vector.extract_strided_slice %307 {offsets = [0, 96], sizes = [2, 32], strides = [1, 1]} : vector<2x128xf32> to vector<2x32xf32>
    %328 = math.tanh %319 : vector<2x32xf32>
    %329 = arith.mulf %327, %328 : vector<2x32xf32>
    %330 = vector.extract_strided_slice %312 {offsets = [0, 96], sizes = [2, 32], strides = [1, 1]} : vector<2x128xf32> to vector<2x32xf32>
    %331 = math.tanh %326 : vector<2x32xf32>
    %332 = arith.mulf %330, %331 : vector<2x32xf32>
    %c2_i32_96 = arith.constant 2 : i32
    %333 = arith.muli %c6_i32, %c2_i32_96 : i32
    %334 = arith.index_cast %333 : i32 to index
    %c0_97 = arith.constant 0 : index
    %335 = vector.load %arg9[%334, %c0_97] : memref<16x64xf32, #tpu.memory_space<vmem>>, vector<2x32xf32>
    tpu.vector_store %arg9[%334, %c0_97], %329 {strides = array<i32>} : memref<16x64xf32, #tpu.memory_space<vmem>>, vector<2x32xf32>,
    %c2_i32_98 = arith.constant 2 : i32
    %336 = arith.muli %292, %c2_i32_98 : i32
    %337 = arith.index_cast %336 : i32 to index
    %c32_99 = arith.constant 32 : index
    %338 = vector.load %arg9[%337, %c32_99] : memref<16x64xf32, #tpu.memory_space<vmem>>, vector<2x32xf32>
    tpu.vector_store %arg9[%337, %c32_99], %332 {strides = array<i32>} : memref<16x64xf32, #tpu.memory_space<vmem>>, vector<2x32xf32>,
    %c7_i32_100 = arith.constant 7 : i32
    %c7_i32_101 = arith.constant 7 : i32
    %339 = arith.subi %c7_i32_101, %c7_i32_100 : i32
    %c2_i32_102 = arith.constant 2 : i32
    %340 = arith.muli %c7_i32_100, %c2_i32_102 : i32
    %341 = arith.index_cast %340 : i32 to index
    %c0_103 = arith.constant 0 : index
    %342 = vector.load %arg8[%341, %c0_103] : memref<16x256xf32, #tpu.memory_space<vmem>>, vector<2x128xf32>
    %cst_104 = arith.constant dense<0.000000e+00> : vector<2x128xf32>
    %343 = tpu.matmul %329, %7, %cst_104 {dimension_numbers = #tpu.dot_dimension_numbers<[1], [0], [0], [1], [0, 0, 1, 1], [], []>} : vector<2x32xf32>, vector<32x128xf32>, vector<2x128xf32> -> vector<2x128xf32>
    %344 = arith.addf %342, %343 : vector<2x128xf32>
    %c2_i32_105 = arith.constant 2 : i32
    %345 = arith.muli %339, %c2_i32_105 : i32
    %346 = arith.index_cast %345 : i32 to index
    %c128_106 = arith.constant 128 : index
    %347 = vector.load %arg8[%346, %c128_106] : memref<16x256xf32, #tpu.memory_space<vmem>>, vector<2x128xf32>
    %cst_107 = arith.constant dense<0.000000e+00> : vector<2x128xf32>
    %348 = tpu.matmul %332, %8, %cst_107 {dimension_numbers = #tpu.dot_dimension_numbers<[1], [0], [0], [1], [0, 0, 1, 1], [], []>} : vector<2x32xf32>, vector<32x128xf32>, vector<2x128xf32> -> vector<2x128xf32>
    %349 = arith.addf %347, %348 : vector<2x128xf32>
    %350 = arith.negf %344 : vector<2x128xf32>
    %351 = math.exp %350 : vector<2x128xf32>
    %cst_108 = arith.constant 1.000000e+00 : f32
    %352 = vector.broadcast %cst_108 : f32 to vector<2x128xf32>
    %353 = arith.addf %352, %351 : vector<2x128xf32>
    %354 = arith.divf %352, %353 : vector<2x128xf32>
    %355 = arith.negf %349 : vector<2x128xf32>
    %356 = math.exp %355 : vector<2x128xf32>
    %cst_109 = arith.constant 1.000000e+00 : f32
    %357 = vector.broadcast %cst_109 : f32 to vector<2x128xf32>
    %358 = arith.addf %357, %356 : vector<2x128xf32>
    %359 = arith.divf %357, %358 : vector<2x128xf32>
    %360 = vector.extract_strided_slice %354 {offsets = [0, 32], sizes = [2, 32], strides = [1, 1]} : vector<2x128xf32> to vector<2x32xf32>
    %361 = arith.mulf %360, %319 : vector<2x32xf32>
    %362 = vector.extract_strided_slice %354 {offsets = [0, 0], sizes = [2, 32], strides = [1, 1]} : vector<2x128xf32> to vector<2x32xf32>
    %363 = vector.extract_strided_slice %344 {offsets = [0, 64], sizes = [2, 32], strides = [1, 1]} : vector<2x128xf32> to vector<2x32xf32>
    %364 = math.tanh %363 : vector<2x32xf32>
    %365 = arith.mulf %362, %364 : vector<2x32xf32>
    %366 = arith.addf %361, %365 : vector<2x32xf32>
    %367 = vector.extract_strided_slice %359 {offsets = [0, 32], sizes = [2, 32], strides = [1, 1]} : vector<2x128xf32> to vector<2x32xf32>
    %368 = arith.mulf %367, %326 : vector<2x32xf32>
    %369 = vector.extract_strided_slice %359 {offsets = [0, 0], sizes = [2, 32], strides = [1, 1]} : vector<2x128xf32> to vector<2x32xf32>
    %370 = vector.extract_strided_slice %349 {offsets = [0, 64], sizes = [2, 32], strides = [1, 1]} : vector<2x128xf32> to vector<2x32xf32>
    %371 = math.tanh %370 : vector<2x32xf32>
    %372 = arith.mulf %369, %371 : vector<2x32xf32>
    %373 = arith.addf %368, %372 : vector<2x32xf32>
    %374 = vector.extract_strided_slice %354 {offsets = [0, 96], sizes = [2, 32], strides = [1, 1]} : vector<2x128xf32> to vector<2x32xf32>
    %375 = math.tanh %366 : vector<2x32xf32>
    %376 = arith.mulf %374, %375 : vector<2x32xf32>
    %377 = vector.extract_strided_slice %359 {offsets = [0, 96], sizes = [2, 32], strides = [1, 1]} : vector<2x128xf32> to vector<2x32xf32>
    %378 = math.tanh %373 : vector<2x32xf32>
    %379 = arith.mulf %377, %378 : vector<2x32xf32>
    %c2_i32_110 = arith.constant 2 : i32
    %380 = arith.muli %c7_i32_100, %c2_i32_110 : i32
    %381 = arith.index_cast %380 : i32 to index
    %c0_111 = arith.constant 0 : index
    %382 = vector.load %arg9[%381, %c0_111] : memref<16x64xf32, #tpu.memory_space<vmem>>, vector<2x32xf32>
    tpu.vector_store %arg9[%381, %c0_111], %376 {strides = array<i32>} : memref<16x64xf32, #tpu.memory_space<vmem>>, vector<2x32xf32>,
    %c2_i32_112 = arith.constant 2 : i32
    %383 = arith.muli %339, %c2_i32_112 : i32
    %384 = arith.index_cast %383 : i32 to index
    %c32_113 = arith.constant 32 : index
    %385 = vector.load %arg9[%384, %c32_113] : memref<16x64xf32, #tpu.memory_space<vmem>>, vector<2x32xf32>
    tpu.vector_store %arg9[%384, %c32_113], %379 {strides = array<i32>} : memref<16x64xf32, #tpu.memory_space<vmem>>, vector<2x32xf32>,
    %c8_i32 = arith.constant 8 : i32
    %c0_114 = arith.constant 0 : index
    %c0_115 = arith.constant 0 : index
    %386 = vector.load %arg9[%c0_114, %c0_115] : memref<16x64xf32, #tpu.memory_space<vmem>>, vector<16x64xf32>
    %c0_116 = arith.constant 0 : index
    %c0_117 = arith.constant 0 : index
    %387 = vector.load %arg5[%c0_116, %c0_117] : memref<64x12xf32, #tpu.memory_space<vmem>>, vector<64x12xf32>
    %cst_118 = arith.constant dense<0.000000e+00> : vector<16x12xf32>
    %388 = tpu.matmul %386, %387, %cst_118 {dimension_numbers = #tpu.dot_dimension_numbers<[1], [0], [0], [1], [0, 0, 1, 1], [], []>} : vector<16x64xf32>, vector<64x12xf32>, vector<16x12xf32> -> vector<16x12xf32>
    %c0_119 = arith.constant 0 : index
    %c0_120 = arith.constant 0 : index
    %389 = vector.load %arg6[%c0_119, %c0_120] : memref<1x12xf32, #tpu.memory_space<vmem>>, vector<1x12xf32>
    %390 = vector.broadcast %389 : vector<1x12xf32> to vector<16x12xf32>
    %391 = arith.addf %388, %390 : vector<16x12xf32>
    %c0_121 = arith.constant 0 : index
    %c0_122 = arith.constant 0 : index
    %392 = vector.load %arg7[%c0_121, %c0_122] : memref<16x12xf32, #tpu.memory_space<vmem>>, vector<16x12xf32>
    tpu.vector_store %arg7[%c0_121, %c0_122], %391 {strides = array<i32>} : memref<16x12xf32, #tpu.memory_space<vmem>>, vector<16x12xf32>,
    return
  }
}

</mosaic_0001>

<bundles_post_ra>
// kernel: tpu_custom_call.1
= control target key start
LH: loop header
LB: loop body
LE: loop exit
PB: predicated region body
PF: predicated region fallthrough
CT: control target
= control target key end

     0   :  { %12 = vsyncpa [#allocation5], 0  ;;  %s2047_s0 = inlined_call_operand.vmem [shape: f32[16,16], index: 0, kind: input, shape index: {}]   ;;  %s2048_s1 = inlined_call_operand.vmem [shape: f32[16,256], index: 1, kind: input, shape index: {}]   ;;  %s2049_s2 = inlined_call_operand.hbm [shape: f32[1,256], index: 2, kind: input, shape index: {}]   ;;  %s2050_s3 = inlined_call_operand.vmem [shape: f32[32,128], index: 3, kind: input, shape index: {}]   ;;  %s2051_s4 = inlined_call_operand.hbm [shape: f32[32,128], index: 4, kind: input, shape index: {}]   ;;  %s2052_s5 = inlined_call_operand.vmem [shape: f32[64,12], index: 5, kind: input, shape index: {}]   ;;  %s2053_s6 = inlined_call_operand.vmem [shape: f32[1,12], index: 6, kind: input, shape index: {}]   ;;  %s2054_s7 = inlined_call_operand.hbm [shape: f32[16,12], index: 7, kind: output, shape index: {}]  }
   0x1   :  { %13 = vsyncpa [#allocation8], 0 }
   0x2   :  { %14 = vsyncpa [#allocation6], 0  ;;  %s24_s26 = sshll.u32 %s2049_s2, 4  ;;  %s1631_s27 = smov [#allocation4]   ;;  %s25_s26 = int_to_ptr.hbm [resolvable:$true] %s24_s26 }
   0x3   :  { %s26_s28 = sshll.u32 %s1631_s27, 4  ;;  %s36_s8 = sshll.u32 %s2051_s4, 4  ;;  %s27_s28 = int_to_ptr.vmem [resolvable:$true] %s26_s28  ;;  %s37_s8 = int_to_ptr.hbm [resolvable:$true] %s36_s8 }
   0x4   :  { %29 = dma.hbm_to_vmem [thread:$0]  %s25_s26, 32, %s27_s28, [#allocation5]  }
   0x5   :  { %s1632_s9 = smov [#allocation7]   ;;  %s1633_s11 = smov 128  }
   0x6   :  { %s38_s10 = sshll.u32 %s1632_s9, 4  ;;  %s1634_s12 = smov 8   ;;  %s39_s10 = int_to_ptr.vmem [resolvable:$true] %s38_s10 }
   0x7   :  { %44 = dma.hbm_to_vmem [thread:$0]  %s37_s8, 512, %s39_s10, [#allocation8], %s1633_s11, %s1633_s11, %s1634_s12  }
   0x8   :  { %1625 = dma.done.wait [#allocation5], 32  }
   0x9   :  { %1626 = vsyncadd [#allocation5], 4294967264 }
   0xa   :  { %1627 = dma.done.wait [#allocation8], 512  }
   0xb   :  { %1628 = vsyncadd [#allocation8], 4294966784  ;;  %v61_v0 = vld [vmem:[%s2048_s1 + $0x10] sm:$0xff]  ;;  %v59_v1 = vld [vmem:[%s2048_s1] sm:$0xff]  ;;  %vm69_vm0 = vcmask 130048   ;;  %v1635_v14 = vmov 0.0  }
   0xc   :  { %90 = vmatpush.msra.mxu1 %v61_v0  ;;  %1414 = vmatpush.msra.mxu2 %v61_v0  ;;  %v57_v2 = vld [vmem:[%s2047_s0] sm:$0xff]  ;;  %v58_v3 = vld [vmem:[%s2047_s0 + $0x8] sm:$0xff]  ;;  %v1703_v4 = vld [vmem:[%s2050_s3 + $0x18] sm:$0xff]  ;;  %s1637_s29 = smov 32   ;;  %vm135_vm9 = vcmask 261120   ;;  %vm263_vm10 = vcmask 254976  }
   0xd   :  { %v62_v5 = vld [vmem:[%s2048_s1 + $0x18] sm:$0xff]  ;;  %438 = vmatpush.msra.mxu0 %v1703_v4  ;;  %v1709_v6 = vld [vmem:[#allocation7 + $0x18] sm:$0xff]  ;;  %v1722_v9 = vld [vmem:[#allocation7 + $0x10] sm:$0xff]  ;;  %s1364_s27 = sshll.u32 %s2054_s7, 4  ;;  %s1365_s27 = int_to_ptr.hbm [resolvable:$true] %s1364_s27 }
   0xe   :  { %91 = vmatpush.msra.mxu1 %v59_v1  ;;  %1415 = vmatpush.msra.mxu2 %v59_v1  ;;  %v1716_v7 = vld [vmem:[%s2050_s3 + $0x10] sm:$0xff]  ;;  %v60_v8 = vld [vmem:[%s2048_s1 + $0x8] sm:$0xff]  ;;  %v1732_v11 = vld [vmem:[#allocation7 + $0x8] sm:$0xff] }
   0xf   :  { %1378 = vmatmul.msk.f32.vlgmr.msra.gmra.mxu1 %vm69_vm0, %v57_v2  ;;  %1379 = vmatmul.msk.f32.vlgmr.msra.gmra.mxu2 %vm69_vm0, %v58_v3  ;;  %v1727_v10 = vld [vmem:[%s2050_s3 + $0x8] sm:$0xff]  ;;  %v1737_v12 = vld [vmem:[%s2050_s3] sm:$0xff]  ;;  %v1744_v13 = vld [vmem:[#allocation7] sm:$0xff]  ;;  %s1636_s3 = smov 64  }
  0x10   :  { %113 = vmatpush.msrb.mxu1 %v62_v5  ;;  %151 = vmatpush.msrb.mxu2 %v1703_v4  ;;  %v63_v15 = vld [vmem:[#allocation4] sm:$0x3] }
  0x11   :  { %173 = vmatpush.msra.mxu3 %v1709_v6  ;;  %439 = vmatpush.msra.mxu0 %v1716_v7  ;;  %v65_v16 = vperm.slane %v63_v15, 0  ;;  %v66_v19 = vperm.slane %v63_v15, 1 }
  0x12   :  { %152 = vmatpush.msrb.mxu2 %v1716_v7  ;;  %114 = vmatpush.msrb.mxu1 %v60_v8 }
  0x13   :  { %174 = vmatpush.msra.mxu3 %v1722_v9  ;;  %440 = vmatpush.msra.mxu0 %v1727_v10 }
  0x14   :  { %468 = vmatpush.msra.mxu1 %v1709_v6  ;;  %153 = vmatpush.msrb.mxu2 %v1727_v10 }
  0x15   :  { %175 = vmatpush.msra.mxu3 %v1732_v11  ;;  %441 = vmatpush.msra.mxu0 %v1737_v12 }
  0x16   :  { %469 = vmatpush.msra.mxu1 %v1722_v9  ;;  %154 = vmatpush.msrb.mxu2 %v1737_v12 }
  0x17   :  { %1380 = vmatmul.msk.f32.vlgmr.msrb.gmra.mxu1 %vm69_vm0, %v57_v2  ;;  %155 = vmatmul.f32.vlgmr.msrb.gmra.mxu2 %v1635_v14 }
  0x18   :  { %176 = vmatpush.msra.mxu3 %v1744_v13  ;;  %286 = vmatpush.msra.mxu2 %v1703_v4 }
  0x19   :  { %177 = vmatmul.f32.vlgmr.msra.gmra.mxu3 %v1635_v14  ;;  %470 = vmatpush.msra.mxu1 %v1732_v11 }
  0x1a   :  { %316 = vmatpush.msrb.mxu3 %v1709_v6  ;;  %287 = vmatpush.msra.mxu2 %v1716_v7 }
  0x1b   :  { %471 = vmatpush.msra.mxu1 %v1744_v13  ;;  %739 = vmatpush.msrb.mxu0 %v1703_v4 }
  0x1c   :  { %317 = vmatpush.msrb.mxu3 %v1722_v9  ;;  %288 = vmatpush.msra.mxu2 %v1727_v10 }
  0x1d   :  { %765 = vmatpush.msrb.mxu1 %v1709_v6  ;;  %740 = vmatpush.msrb.mxu0 %v1716_v7 }
  0x1e   :  { %318 = vmatpush.msrb.mxu3 %v1732_v11  ;;  %289 = vmatpush.msra.mxu2 %v1737_v12 }
  0x1f   :  { %1381 = vmatmul.msk.f32.gmra.mxu1 %vm69_vm0, %v58_v3  ;;  %741 = vmatpush.msrb.mxu0 %v1727_v10 }
  0x20   :  { %590 = vmatpush.msrb.mxu2 %v1703_v4  ;;  %319 = vmatpush.msrb.mxu3 %v1744_v13 }
  0x21   :  { %766 = vmatpush.msrb.mxu1 %v1722_v9  ;;  %742 = vmatpush.msrb.mxu0 %v1737_v12 }
  0x22   :  { %620 = vmatpush.msra.mxu3 %v1709_v6  ;;  %591 = vmatpush.msrb.mxu2 %v1716_v7 }
  0x23   :  { %767 = vmatpush.msrb.mxu1 %v1732_v11 }
  0x24   :  { %621 = vmatpush.msra.mxu3 %v1722_v9  ;;  %592 = vmatpush.msrb.mxu2 %v1727_v10 }
  0x25   :  { %768 = vmatpush.msrb.mxu1 %v1744_v13 }
  0x26   :  { %622 = vmatpush.msra.mxu3 %v1732_v11  ;;  %593 = vmatpush.msrb.mxu2 %v1737_v12 }
  0x28   :  { %623 = vmatpush.msra.mxu3 %v1744_v13 }
  0x8c   :  { %v93_v17 = vpop.f32.mrf.mxu1 }
  0x8d   :  { %v94_v18 = vadd.f32 %v93_v17, %v65_v16 }
  0x8f   :  { %122 = vst [vmem:[#allocation2 + $0x10] sm:$0xff] %v94_v18 }
  0x92   :  { %v96_v20 = vpop.f32.mrf.mxu2 }
  0x93   :  { %v97_v21 = vadd.f32 %v96_v20, %v65_v16 }
  0x94   :  { %v116_v22 = vpop.f32.mrf.mxu1 }
  0x95   :  { %124 = vst [vmem:[#allocation2 + $0x18] sm:$0xff] %v97_v21  ;;  %v117_v23 = vadd.f32 %v116_v22, %v66_v19 }
  0x96   :  { %v134_v31 = vld [vmem:[#allocation2 + $0x10] sm:$0x3] }
  0x97   :  { %123 = vst [vmem:[#allocation2] sm:$0xff] %v117_v23 }
  0x9a   :  { %v156_v30 = vpop.f32.mrf.mxu2 }
  0x9b   :  { %v159_v32 = vadd.f32 %v156_v30, %v134_v31  ;;  %v271_v30 = vld [vmem:[#allocation2 + $0x10] sm:$0xc] }
  0x9c   :  { %v119_v24 = vpop.f32.mrf.mxu1  ;;  %v178_v26 = vpop.f32.mrf.mxu3 }
  0x9d   :  { %v120_v25 = vadd.f32 %v119_v24, %v66_v19  ;;  %v182_v27 = vrot.slane %v178_v26, 2  ;;  %v1382_v36 = vmul.f32 -1.442695, %v159_v32 }
  0x9f   :  { %125 = vst [vmem:[#allocation2 + $0x8] sm:$0xff] %v120_v25 }
  0xa6   :  { %v160_v28 = vld [vmem:[#allocation2 + $0x8] sm:$0xc0]  ;;  %v298_v26 = vld [vmem:[#allocation2 + $0x8] sm:$0x30] }
  0xa7   :  { %v184_v29 = vadd.f32 %v182_v27, %v160_v28 }
  0xa9   :  { %1425 = vtanh.f32 %v184_v29  ;;  %v1383_v35 = vmul.f32 -1.442695, %v184_v29 }
  0xaa   :  { %1427 = vtanh.f32 %v159_v32 }
  0xab   :  { %1429 = vpow2.f32 %v1383_v35 }
  0xac   :  { %1431 = vpow2.f32 %v1382_v36 }
  0xaf   :  { %v1426_v33 = vpop.eup %1425 }
  0xb0   :  { %238 = vrot.lane.b32.xlu0 %v1426_v33, %s1636_s3  ;;  %v1428_v34 = vpop.eup %1427 }
  0xb1   :  { %v1430_v37 = vpop.eup %1429 }
  0xb2   :  { %v207_v38 = vadd.f32 1.0, %v1430_v37  ;;  %v1432_v39 = vpop.eup %1431 }
  0xb3   :  { %v188_v40 = vadd.f32 1.0, %v1432_v39 }
  0xb4   :  { %1433 = vrcp.f32 %v207_v38  ;;  %v219_v49 = vand.u32 2147483648, %v207_v38  ;;  %vm213_vm2 = vweird.f32 %v207_v38  ;;  %v217_v50 = vand.u32 2147483647, %v207_v38 }
  0xb5   :  { %1435 = vrcp.f32 %v188_v40  ;;  %v200_v58 = vand.u32 2147483648, %v188_v40  ;;  %vm194_vm6 = vweird.f32 %v188_v40  ;;  %v198_v59 = vand.u32 2147483647, %v188_v40 }
  0xb6   :  { %v220_v53 = vor.u32 1.1754944e-38, %v219_v49  ;;  %vm218_vm4 = vcmp.eq.f32.partialorder %v217_v50, 8.507059e+37 }
  0xb7   :  { %v201_v61 = vor.u32 1.1754944e-38, %v200_v58  ;;  %vm199_vm8 = vcmp.eq.f32.partialorder %v198_v59, 8.507059e+37 }
  0xb8   :  { %226 = vrot.lane.b32.xlu0 %v1428_v34, %s1636_s3 }
  0xba   :  { %v1434_v41 = vpop.eup %1433 }
  0xbb   :  { %v209_v42 = vmul.f32 %v1434_v41, %v207_v38  ;;  %v1436_v44 = vpop.eup %1435  ;;  %vm214_vm1 = vweird.f32 %v1434_v41 }
  0xbc   :  { %v190_v46 = vmul.f32 %v1436_v44, %v188_v40  ;;  %vm215_vm3 = vmor %vm213_vm2, %vm214_vm1  ;;  %vm195_vm5 = vweird.f32 %v1436_v44 }
  0xbd   :  { %v210_v43 = vsub.f32 1.0, %v209_v42  ;;  %vm196_vm7 = vmor %vm194_vm6, %vm195_vm5 }
  0xbe   :  { %v191_v48 = vsub.f32 1.0, %v190_v46 }
  0xbf   :  { %v211_v45 = vmul.f32 %v1434_v41, %v210_v43 }
  0xc0   :  { %v192_v52 = vmul.f32 %v1436_v44, %v191_v48 }
  0xc1   :  { %v212_v47 = vadd.f32 %v1434_v41, %v211_v45 }
  0xc2   :  { %v193_v57 = vadd.f32 %v1436_v44, %v192_v52 }
  0xc3   :  { %v216_v51 = vsel %vm215_vm3, %v1434_v41, %v212_v47 }
  0xc4   :  { %v221_v55 = vsel %vm218_vm4, %v220_v53, %v216_v51  ;;  %v197_v60 = vsel %vm196_vm7, %v1436_v44, %v193_v57 }
  0xc5   :  { %v202_v63 = vsel %vm199_vm8, %v201_v61, %v197_v60  ;;  %v235_v1 = vmul.f32 0.0, %v221_v55 }
  0xc6   :  { %v223_v5 = vmul.f32 0.0, %v202_v63 }
 0x122   :  { %v239_v54 = vpop.permute.xlu0 %238 }
 0x123   :  { %v241_v56 = vmul.f32 %v239_v54, %v221_v55 }
 0x125   :  { %243 = vrot.lane.b32.xlu1 %v241_v56, %s1637_s29 }
 0x12a   :  { %v227_v62 = vpop.permute.xlu0 %226 }
 0x12b   :  { %v229_v0 = vmul.f32 %v227_v62, %v202_v63 }
 0x12d   :  { %231 = vrot.lane.b32.xlu1 %v229_v0, %s1637_s29 }
 0x197   :  { %v244_v2 = vpop.permute.xlu1 %243 }
 0x198   :  { %v1782_v3 = vadd.f32 %v244_v2, %v235_v1 }
 0x19a   :  { %1437 = vtanh.f32 %v1782_v3  ;;  %v382_v0 = vrot.slane %v1782_v3, 2 }
 0x19f   :  { %v232_v8 = vpop.permute.xlu1 %231 }
 0x1a0   :  { %v1438_v14 = vpop.eup %1437  ;;  %v1785_v15 = vadd.f32 %v232_v8, %v223_v5 }
 0x1a1   :  { %255 = vrot.lane.b32.xlu2 %v1438_v14, %s1636_s3 }
 0x1a2   :  { %1439 = vtanh.f32 %v1785_v15  ;;  %v367_v8 = vrot.slane %v1785_v15, 6 }
 0x1a8   :  { %v1440_v16 = vpop.eup %1439 }
 0x1a9   :  { %249 = vrot.lane.b32.xlu2 %v1440_v16, %s1636_s3 }
 0x1fb   :  { %v256_v17 = vpop.permute.xlu2 %255 }
 0x1fc   :  { %v1790_v18 = vmul.f32 %v256_v17, %v221_v55 }
 0x1fe   :  { %v299_v19 = vrot.slane %v1790_v18, 6 }
 0x200   :  { %300 = vrot.lane.b32.xlu0 %v299_v19, %s1637_s29 }
 0x203   :  { %v250_v20 = vpop.permute.xlu2 %249 }
 0x204   :  { %v252_v21 = vmul.f32 %v250_v20, %v202_v63 }
 0x206   :  { %260 = vrot.lane.b32.xlu1 %v252_v21, %s1637_s29 }
 0x272   :  { %v301_v22 = vpop.permute.xlu0 %300 }
 0x273   :  { %1385 = vmatmul.msk.f32.vlgmr.msrb.gmra.mxu3 %vm135_vm9, %v301_v22 }
 0x274   :  { %912 = vmatpush.msrb.mxu3 %v1709_v6 }
 0x276   :  { %913 = vmatpush.msrb.mxu3 %v1722_v9 }
 0x278   :  { %v261_v23 = vpop.permute.xlu1 %260  ;;  %914 = vmatpush.msrb.mxu3 %v1732_v11 }
 0x279   :  { %264 = vst.msk [vmem:[#allocation3] sm:$0x3] %vm263_vm10, %v261_v23  ;;  %1384 = vmatmul.msk.f32.vlgmr.msra.gmra.mxu2 %vm135_vm9, %v261_v23 }
 0x27a   :  { %915 = vmatpush.msrb.mxu3 %v1744_v13  ;;  %882 = vmatpush.msra.mxu2 %v1703_v4 }
 0x27c   :  { %883 = vmatpush.msra.mxu2 %v1716_v7 }
 0x27e   :  { %884 = vmatpush.msra.mxu2 %v1727_v10 }
 0x280   :  { %885 = vmatpush.msra.mxu2 %v1737_v12 }
 0x2f6   :  { %v321_v24 = vpop.f32.mrf.mxu3 }
 0x2f7   :  { %v325_v25 = vrot.slane %v321_v24, 4 }
 0x2f9   :  { %v327_v27 = vadd.f32 %v325_v25, %v298_v26 }
 0x2fb   :  { %1441 = vtanh.f32 %v327_v27  ;;  %v1387_v34 = vmul.f32 -1.442695, %v327_v27 }
 0x2fc   :  { %v291_v28 = vpop.f32.mrf.mxu2 }
 0x2fd   :  { %v295_v29 = vrot.slane %v291_v28, 6 }
 0x2ff   :  { %v297_v31 = vadd.f32 %v295_v29, %v271_v30  ;;  %v450_v29 = vld [vmem:[#allocation2 + $0x8] sm:$0xc] }
 0x301   :  { %v1442_v32 = vpop.eup %1441  ;;  %1443 = vtanh.f32 %v297_v31  ;;  %v1386_v39 = vmul.f32 -1.442695, %v297_v31 }
 0x302   :  { %387 = vrot.lane.b32.xlu2 %v1442_v32, %s1636_s3  ;;  %1445 = vpow2.f32 %v1387_v34  ;;  %v420_v34 = vld [vmem:[#allocation2 + $0x10] sm:$0x30] }
 0x307   :  { %v1444_v33 = vpop.eup %1443 }
 0x308   :  { %372 = vrot.lane.b32.xlu0 %v1444_v33, %s1636_s3  ;;  %v1446_v35 = vpop.eup %1445 }
 0x309   :  { %v350_v36 = vadd.f32 1.0, %v1446_v35 }
 0x30b   :  { %1447 = vrcp.f32 %v350_v36  ;;  %v362_v43 = vand.u32 2147483648, %v350_v36  ;;  %vm356_vm12 = vweird.f32 %v350_v36  ;;  %v360_v45 = vand.u32 2147483647, %v350_v36 }
 0x30c   :  { %1449 = vpow2.f32 %v1386_v39 }
 0x30d   :  { %v363_v48 = vor.u32 1.1754944e-38, %v362_v43  ;;  %vm361_vm14 = vcmp.eq.f32.partialorder %v360_v45, 8.507059e+37 }
 0x311   :  { %v1448_v37 = vpop.eup %1447 }
 0x312   :  { %v352_v38 = vmul.f32 %v1448_v37, %v350_v36  ;;  %vm357_vm11 = vweird.f32 %v1448_v37  ;;  %v1450_v44 = vpop.eup %1449 }
 0x313   :  { %vm358_vm13 = vmor %vm356_vm12, %vm357_vm11  ;;  %v331_v47 = vadd.f32 1.0, %v1450_v44 }
 0x314   :  { %v353_v40 = vsub.f32 1.0, %v352_v38 }
 0x315   :  { %1451 = vrcp.f32 %v331_v47  ;;  %v343_v57 = vand.u32 2147483648, %v331_v47  ;;  %vm337_vm0 = vweird.f32 %v331_v47  ;;  %v341_v58 = vand.u32 2147483647, %v331_v47 }
 0x316   :  { %v354_v41 = vmul.f32 %v1448_v37, %v353_v40 }
 0x317   :  { %v344_v60 = vor.u32 1.1754944e-38, %v343_v57  ;;  %vm342_vm2 = vcmp.eq.f32.partialorder %v341_v58, 8.507059e+37 }
 0x318   :  { %v355_v42 = vadd.f32 %v1448_v37, %v354_v41 }
 0x31a   :  { %v359_v46 = vsel %vm358_vm13, %v1448_v37, %v355_v42 }
 0x31b   :  { %v364_v49 = vsel %vm361_vm14, %v363_v48, %v359_v46  ;;  %v1452_v52 = vpop.eup %1451 }
 0x31c   :  { %v333_v53 = vmul.f32 %v1452_v52, %v331_v47  ;;  %vm338_vm15 = vweird.f32 %v1452_v52  ;;  %v384_v1 = vmul.f32 %v382_v0, %v364_v49 }
 0x31d   :  { %vm339_vm1 = vmor %vm337_vm0, %vm338_vm15 }
 0x31e   :  { %v334_v54 = vsub.f32 1.0, %v333_v53 }
 0x320   :  { %v335_v55 = vmul.f32 %v1452_v52, %v334_v54 }
 0x322   :  { %v336_v56 = vadd.f32 %v1452_v52, %v335_v55 }
 0x324   :  { %v340_v59 = vsel %vm339_vm1, %v1452_v52, %v336_v56 }
 0x325   :  { %v345_v62 = vsel %vm342_vm2, %v344_v60, %v340_v59 }
 0x326   :  { %v369_v14 = vmul.f32 %v367_v8, %v345_v62 }
 0x35c   :  { %v388_v50 = vpop.permute.xlu2 %387 }
 0x35d   :  { %v390_v51 = vmul.f32 %v388_v50, %v364_v49 }
 0x35f   :  { %392 = vrot.lane.b32.xlu1 %v390_v51, %s1637_s29 }
 0x37a   :  { %v373_v61 = vpop.permute.xlu0 %372 }
 0x37b   :  { %v375_v63 = vmul.f32 %v373_v61, %v345_v62 }
 0x37d   :  { %377 = vrot.lane.b32.xlu2 %v375_v63, %s1637_s29 }
 0x3d1   :  { %v393_v2 = vpop.permute.xlu1 %392 }
 0x3d2   :  { %v1811_v5 = vadd.f32 %v393_v2, %v384_v1 }
 0x3d4   :  { %1453 = vtanh.f32 %v1811_v5  ;;  %v534_v8 = vrot.slane %v1811_v5, 2 }
 0x3d7   :  { %v378_v16 = vpop.permute.xlu2 %377 }
 0x3d8   :  { %v1815_v17 = vadd.f32 %v378_v16, %v369_v14 }
 0x3da   :  { %v1454_v19 = vpop.eup %1453  ;;  %1455 = vtanh.f32 %v1815_v17 }
 0x3db   :  { %404 = vrot.lane.b32.xlu0 %v1454_v19, %s1636_s3 }
 0x3e0   :  { %v1456_v20 = vpop.eup %1455 }
 0x3e1   :  { %398 = vrot.lane.b32.xlu1 %v1456_v20, %s1636_s3  ;;  %v519_v20 = vrot.slane %v1815_v17, 6 }
 0x44d   :  { %v405_v3 = vpop.permute.xlu0 %404 }
 0x44e   :  { %v1820_v21 = vmul.f32 %v405_v3, %v364_v49 }
 0x450   :  { %v451_v22 = vrot.slane %v1820_v21, 4 }
 0x452   :  { %452 = vrot.lane.b32.xlu2 %v451_v22, %s1637_s29 }
 0x453   :  { %v399_v15 = vpop.permute.xlu1 %398 }
 0x454   :  { %v1824_v23 = vmul.f32 %v399_v15, %v345_v62 }
 0x456   :  { %v421_v24 = vrot.slane %v1824_v23, 2 }
 0x458   :  { %422 = vrot.lane.b32.xlu0 %v421_v24, %s1637_s29 }
 0x4ac   :  { %v453_v25 = vpop.permute.xlu2 %452 }
 0x4ad   :  { %1389 = vmatmul.msk.f32.vlgmr.msra.gmra.mxu1 %vm135_vm9, %v453_v25 }
 0x4ae   :  { %1062 = vmatpush.msra.mxu1 %v1709_v6 }
 0x4b0   :  { %1063 = vmatpush.msra.mxu1 %v1722_v9 }
 0x4b2   :  { %1064 = vmatpush.msra.mxu1 %v1732_v11 }
 0x4b4   :  { %1065 = vmatpush.msra.mxu1 %v1744_v13 }
 0x4ca   :  { %v423_v26 = vpop.permute.xlu0 %422 }
 0x4cb   :  { %1388 = vmatmul.msk.f32.vlgmr.msra.gmra.mxu0 %vm135_vm9, %v423_v26 }
 0x4cc   :  { %1032 = vmatpush.msra.mxu0 %v1703_v4 }
 0x4ce   :  { %1033 = vmatpush.msra.mxu0 %v1716_v7 }
 0x4d0   :  { %1034 = vmatpush.msra.mxu0 %v1727_v10 }
 0x4d2   :  { %1035 = vmatpush.msra.mxu0 %v1737_v12 }
 0x52a   :  { %v473_v27 = vpop.f32.mrf.mxu1 }
 0x52b   :  { %v477_v28 = vrot.slane %v473_v27, 6 }
 0x52d   :  { %v479_v30 = vadd.f32 %v477_v28, %v450_v29 }
 0x52f   :  { %1457 = vtanh.f32 %v479_v30  ;;  %v1391_v37 = vmul.f32 -1.442695, %v479_v30 }
 0x535   :  { %v1458_v31 = vpop.eup %1457 }
 0x536   :  { %539 = vrot.lane.b32.xlu1 %v1458_v31, %s1636_s3 }
 0x548   :  { %v443_v32 = vpop.f32.mrf.mxu0 }
 0x549   :  { %v447_v33 = vrot.slane %v443_v32, 4  ;;  %v602_v32 = vld [vmem:[#allocation2 + $0x8] sm:$0x3] }
 0x54b   :  { %v449_v35 = vadd.f32 %v447_v33, %v420_v34 }
 0x54d   :  { %1459 = vtanh.f32 %v449_v35  ;;  %v1390_v38 = vmul.f32 -1.442695, %v449_v35  ;;  %v572_v35 = vld [vmem:[#allocation2 + $0x10] sm:$0xc0] }
 0x54e   :  { %1461 = vpow2.f32 %v1391_v37 }
 0x54f   :  { %1463 = vpow2.f32 %v1390_v38 }
 0x553   :  { %v1460_v36 = vpop.eup %1459 }
 0x554   :  { %524 = vrot.lane.b32.xlu2 %v1460_v36, %s1636_s3  ;;  %v1462_v39 = vpop.eup %1461 }
 0x555   :  { %v502_v40 = vadd.f32 1.0, %v1462_v39  ;;  %v1464_v41 = vpop.eup %1463 }
 0x556   :  { %v483_v42 = vadd.f32 1.0, %v1464_v41 }
 0x557   :  { %1465 = vrcp.f32 %v502_v40  ;;  %v514_v51 = vand.u32 2147483648, %v502_v40  ;;  %vm508_vm4 = vweird.f32 %v502_v40  ;;  %v512_v52 = vand.u32 2147483647, %v502_v40 }
 0x558   :  { %1467 = vrcp.f32 %v483_v42  ;;  %v495_v59 = vand.u32 2147483648, %v483_v42  ;;  %vm489_vm8 = vweird.f32 %v483_v42  ;;  %v493_v61 = vand.u32 2147483647, %v483_v42 }
 0x559   :  { %v515_v55 = vor.u32 1.1754944e-38, %v514_v51  ;;  %vm513_vm6 = vcmp.eq.f32.partialorder %v512_v52, 8.507059e+37 }
 0x55a   :  { %v496_v63 = vor.u32 1.1754944e-38, %v495_v59  ;;  %vm494_vm12 = vcmp.eq.f32.partialorder %v493_v61, 8.507059e+37 }
 0x55d   :  { %v1466_v43 = vpop.eup %1465 }
 0x55e   :  { %v504_v44 = vmul.f32 %v1466_v43, %v502_v40  ;;  %v1468_v45 = vpop.eup %1467  ;;  %vm509_vm3 = vweird.f32 %v1466_v43 }
 0x55f   :  { %v485_v47 = vmul.f32 %v1468_v45, %v483_v42  ;;  %vm510_vm5 = vmor %vm508_vm4, %vm509_vm3  ;;  %vm490_vm7 = vweird.f32 %v1468_v45 }
 0x560   :  { %v505_v46 = vsub.f32 1.0, %v504_v44  ;;  %vm491_vm11 = vmor %vm489_vm8, %vm490_vm7 }
 0x561   :  { %v486_v49 = vsub.f32 1.0, %v485_v47 }
 0x562   :  { %v506_v48 = vmul.f32 %v1466_v43, %v505_v46 }
 0x563   :  { %v487_v53 = vmul.f32 %v1468_v45, %v486_v49 }
 0x564   :  { %v507_v50 = vadd.f32 %v1466_v43, %v506_v48 }
 0x565   :  { %v488_v56 = vadd.f32 %v1468_v45, %v487_v53 }
 0x566   :  { %v511_v54 = vsel %vm510_vm5, %v1466_v43, %v507_v50 }
 0x567   :  { %v516_v58 = vsel %vm513_vm6, %v515_v55, %v511_v54  ;;  %v492_v62 = vsel %vm491_vm11, %v1468_v45, %v488_v56 }
 0x568   :  { %v497_v0 = vsel %vm494_vm12, %v496_v63, %v492_v62  ;;  %v536_v14 = vmul.f32 %v534_v8, %v516_v58 }
 0x569   :  { %v521_v3 = vmul.f32 %v519_v20, %v497_v0 }
 0x5a8   :  { %v540_v57 = vpop.permute.xlu1 %539 }
 0x5a9   :  { %v542_v60 = vmul.f32 %v540_v57, %v516_v58 }
 0x5ab   :  { %544 = vrot.lane.b32.xlu0 %v542_v60, %s1637_s29 }
 0x5ae   :  { %v525_v1 = vpop.permute.xlu2 %524 }
 0x5af   :  { %v527_v2 = vmul.f32 %v525_v1, %v497_v0 }
 0x5b1   :  { %529 = vrot.lane.b32.xlu1 %v527_v2, %s1637_s29 }
 0x61d   :  { %v545_v16 = vpop.permute.xlu0 %544 }
 0x61e   :  { %v1843_v19 = vadd.f32 %v545_v16, %v536_v14 }
 0x620   :  { %1469 = vtanh.f32 %v1843_v19  ;;  %v683_v63 = vrot.slane %v1843_v19, 2 }
 0x623   :  { %v530_v22 = vpop.permute.xlu1 %529 }
 0x624   :  { %v1847_v15 = vadd.f32 %v530_v22, %v521_v3 }
 0x626   :  { %v1470_v24 = vpop.eup %1469  ;;  %1471 = vtanh.f32 %v1847_v15  ;;  %v668_v14 = vrot.slane %v1847_v15, 6 }
 0x627   :  { %556 = vrot.lane.b32.xlu2 %v1470_v24, %s1636_s3 }
 0x62c   :  { %v1472_v25 = vpop.eup %1471 }
 0x62d   :  { %550 = vrot.lane.b32.xlu0 %v1472_v25, %s1636_s3 }
 0x681   :  { %v557_v5 = vpop.permute.xlu2 %556 }
 0x682   :  { %v1852_v26 = vmul.f32 %v557_v5, %v516_v58 }
 0x684   :  { %v603_v27 = vrot.slane %v1852_v26, 2 }
 0x686   :  { %604 = vrot.lane.b32.xlu1 %v603_v27, %s1637_s29 }
 0x69f   :  { %v551_v17 = vpop.permute.xlu0 %550 }
 0x6a0   :  { %v1856_v28 = vmul.f32 %v551_v17, %v497_v0 }
 0x6a2   :  { %v573_v29 = vrot.slane %v1856_v28, 4 }
 0x6a4   :  { %574 = vrot.lane.b32.xlu2 %v573_v29, %s1637_s29 }
 0x6f8   :  { %v605_v30 = vpop.permute.xlu1 %604 }
 0x6f9   :  { %1393 = vmatmul.msk.f32.vlgmr.msra.gmra.mxu3 %vm135_vm9, %v605_v30 }
 0x6fa   :  { %1212 = vmatpush.msra.mxu3 %v1709_v6 }
 0x6fc   :  { %1213 = vmatpush.msra.mxu3 %v1722_v9 }
 0x6fe   :  { %v575_v31 = vpop.permute.xlu2 %574  ;;  %1214 = vmatpush.msra.mxu3 %v1732_v11 }
 0x6ff   :  { %1392 = vmatmul.msk.f32.vlgmr.msrb.gmra.mxu2 %vm135_vm9, %v575_v31  ;;  %v748_v31 = vld [vmem:[#allocation2] sm:$0xc0] }
 0x700   :  { %1182 = vmatpush.msrb.mxu2 %v1703_v4  ;;  %1215 = vmatpush.msra.mxu3 %v1744_v13 }
 0x702   :  { %1183 = vmatpush.msrb.mxu2 %v1716_v7 }
 0x704   :  { %1184 = vmatpush.msrb.mxu2 %v1727_v10 }
 0x706   :  { %1185 = vmatpush.msrb.mxu2 %v1737_v12 }
 0x77c   :  { %v625_v33 = vpop.f32.mrf.mxu3 }
 0x77d   :  { %v628_v6 = vadd.f32 %v625_v33, %v602_v32  ;;  %v721_v33 = vld [vmem:[#allocation2 + $0x18] sm:$0x3] }
 0x77f   :  { %1473 = vtanh.f32 %v628_v6  ;;  %v1395_v7 = vmul.f32 -1.442695, %v628_v6 }
 0x782   :  { %v595_v9 = vpop.f32.mrf.mxu2 }
 0x783   :  { %v599_v34 = vrot.slane %v595_v9, 2 }
 0x785   :  { %v1474_v11 = vpop.eup %1473  ;;  %v601_v36 = vadd.f32 %v599_v34, %v572_v35 }
 0x786   :  { %688 = vrot.lane.b32.xlu0 %v1474_v11, %s1636_s3 }
 0x787   :  { %1475 = vtanh.f32 %v601_v36  ;;  %v1394_v10 = vmul.f32 -1.442695, %v601_v36 }
 0x788   :  { %1477 = vpow2.f32 %v1395_v7 }
 0x789   :  { %1479 = vpow2.f32 %v1394_v10 }
 0x78d   :  { %v1476_v4 = vpop.eup %1475 }
 0x78e   :  { %673 = vrot.lane.b32.xlu1 %v1476_v4, %s1636_s3  ;;  %v1478_v13 = vpop.eup %1477 }
 0x78f   :  { %v651_v12 = vadd.f32 1.0, %v1478_v13  ;;  %v1480_v37 = vpop.eup %1479 }
 0x790   :  { %v632_v38 = vadd.f32 1.0, %v1480_v37 }
 0x791   :  { %1481 = vrcp.f32 %v651_v12  ;;  %v663_v47 = vand.u32 2147483648, %v651_v12  ;;  %vm657_vm14 = vweird.f32 %v651_v12  ;;  %v661_v48 = vand.u32 2147483647, %v651_v12 }
 0x792   :  { %1483 = vrcp.f32 %v632_v38  ;;  %v644_v56 = vand.u32 2147483648, %v632_v38  ;;  %vm638_vm2 = vweird.f32 %v632_v38  ;;  %v642_v57 = vand.u32 2147483647, %v632_v38 }
 0x793   :  { %v664_v51 = vor.u32 1.1754944e-38, %v663_v47  ;;  %vm662_vm0 = vcmp.eq.f32.partialorder %v661_v48, 8.507059e+37 }
 0x794   :  { %v645_v59 = vor.u32 1.1754944e-38, %v644_v56  ;;  %vm643_vm4 = vcmp.eq.f32.partialorder %v642_v57, 8.507059e+37 }
 0x797   :  { %v1482_v39 = vpop.eup %1481 }
 0x798   :  { %v653_v40 = vmul.f32 %v1482_v39, %v651_v12  ;;  %v1484_v42 = vpop.eup %1483  ;;  %vm658_vm13 = vweird.f32 %v1482_v39 }
 0x799   :  { %v634_v44 = vmul.f32 %v1484_v42, %v632_v38  ;;  %vm659_vm15 = vmor %vm657_vm14, %vm658_vm13  ;;  %vm639_vm1 = vweird.f32 %v1484_v42 }
 0x79a   :  { %v654_v41 = vsub.f32 1.0, %v653_v40  ;;  %vm640_vm3 = vmor %vm638_vm2, %vm639_vm1 }
 0x79b   :  { %v635_v46 = vsub.f32 1.0, %v634_v44 }
 0x79c   :  { %v655_v43 = vmul.f32 %v1482_v39, %v654_v41 }
 0x79d   :  { %v636_v50 = vmul.f32 %v1484_v42, %v635_v46 }
 0x79e   :  { %v656_v45 = vadd.f32 %v1482_v39, %v655_v43 }
 0x79f   :  { %v637_v55 = vadd.f32 %v1484_v42, %v636_v50 }
 0x7a0   :  { %v660_v49 = vsel %vm659_vm15, %v1482_v39, %v656_v45 }
 0x7a1   :  { %v665_v53 = vsel %vm662_vm0, %v664_v51, %v660_v49  ;;  %v641_v58 = vsel %vm640_vm3, %v1484_v42, %v637_v55 }
 0x7a2   :  { %v646_v61 = vsel %vm643_vm4, %v645_v59, %v641_v58  ;;  %v685_v0 = vmul.f32 %v683_v63, %v665_v53 }
 0x7a3   :  { %v670_v16 = vmul.f32 %v668_v14, %v646_v61 }
 0x7f8   :  { %v689_v52 = vpop.permute.xlu0 %688 }
 0x7f9   :  { %v691_v54 = vmul.f32 %v689_v52, %v665_v53 }
 0x7fb   :  { %693 = vrot.lane.b32.xlu2 %v691_v54, %s1637_s29 }
 0x800   :  { %v674_v60 = vpop.permute.xlu1 %673 }
 0x801   :  { %v676_v62 = vmul.f32 %v674_v60, %v646_v61 }
 0x803   :  { %678 = vrot.lane.b32.xlu0 %v676_v62, %s1637_s29 }
 0x855   :  { %v694_v1 = vpop.permute.xlu2 %693 }
 0x856   :  { %v1875_v2 = vadd.f32 %v694_v1, %v685_v0 }
 0x858   :  { %1485 = vtanh.f32 %v1875_v2  ;;  %v831_v60 = vrot.slane %v1875_v2, 2 }
 0x85e   :  { %v1486_v8 = vpop.eup %1485 }
 0x85f   :  { %705 = vrot.lane.b32.xlu1 %v1486_v8, %s1636_s3 }
 0x875   :  { %v679_v20 = vpop.permute.xlu0 %678 }
 0x876   :  { %v1880_v3 = vadd.f32 %v679_v20, %v670_v16 }
 0x878   :  { %1487 = vtanh.f32 %v1880_v3  ;;  %v816_v0 = vrot.slane %v1880_v3, 6 }
 0x87e   :  { %v1488_v22 = vpop.eup %1487 }
 0x87f   :  { %699 = vrot.lane.b32.xlu2 %v1488_v22, %s1636_s3 }
 0x8d1   :  { %v706_v19 = vpop.permute.xlu1 %705 }
 0x8d2   :  { %v1884_v24 = vmul.f32 %v706_v19, %v665_v53 }
 0x8d4   :  { %749 = vrot.lane.b32.xlu0 %v1884_v24, %s1637_s29 }
 0x8d9   :  { %v700_v25 = vpop.permute.xlu2 %699 }
 0x8da   :  { %v1888_v5 = vmul.f32 %v700_v25, %v646_v61 }
 0x8dc   :  { %v722_v15 = vrot.slane %v1888_v5, 6 }
 0x8de   :  { %723 = vrot.lane.b32.xlu1 %v722_v15, %s1637_s29 }
 0x946   :  { %v750_v27 = vpop.permute.xlu0 %749 }
 0x947   :  { %1397 = vmatmul.msk.f32.vlgmr.msrb.gmra.mxu1 %vm135_vm9, %v750_v27 }
 0x950   :  { %v724_v17 = vpop.permute.xlu1 %723 }
 0x951   :  { %1396 = vmatmul.msk.f32.vlgmr.msrb.gmra.mxu0 %vm135_vm9, %v724_v17 }
 0x9c4   :  { %v770_v29 = vpop.f32.mrf.mxu1 }
 0x9c5   :  { %v774_v30 = vrot.slane %v770_v29, 2 }
 0x9c7   :  { %v776_v32 = vadd.f32 %v774_v30, %v748_v31  ;;  %v894_v30 = vld [vmem:[#allocation2] sm:$0x30] }
 0x9c9   :  { %1489 = vtanh.f32 %v776_v32  ;;  %v1399_v11 = vmul.f32 -1.442695, %v776_v32 }
 0x9ce   :  { %v744_v6 = vpop.f32.mrf.mxu0 }
 0x9cf   :  { %v1490_v9 = vpop.eup %1489  ;;  %v747_v34 = vadd.f32 %v744_v6, %v721_v33 }
 0x9d0   :  { %836 = vrot.lane.b32.xlu2 %v1490_v9, %s1636_s3  ;;  %v867_v9 = vld [vmem:[#allocation2 + $0x18] sm:$0xc] }
 0x9d1   :  { %1491 = vtanh.f32 %v747_v34  ;;  %v1398_v12 = vmul.f32 -1.442695, %v747_v34 }
 0x9d2   :  { %1493 = vpow2.f32 %v1399_v11 }
 0x9d7   :  { %v1492_v35 = vpop.eup %1491 }
 0x9d8   :  { %821 = vrot.lane.b32.xlu0 %v1492_v35, %s1636_s3  ;;  %v1494_v36 = vpop.eup %1493 }
 0x9d9   :  { %v799_v4 = vadd.f32 1.0, %v1494_v36 }
 0x9db   :  { %1495 = vrcp.f32 %v799_v4  ;;  %v811_v39 = vand.u32 2147483648, %v799_v4  ;;  %vm805_vm6 = vweird.f32 %v799_v4  ;;  %v809_v40 = vand.u32 2147483647, %v799_v4 }
 0x9dc   :  { %1497 = vpow2.f32 %v1398_v12 }
 0x9dd   :  { %v812_v43 = vor.u32 1.1754944e-38, %v811_v39  ;;  %vm810_vm8 = vcmp.eq.f32.partialorder %v809_v40, 8.507059e+37 }
 0x9e1   :  { %v1496_v7 = vpop.eup %1495 }
 0x9e2   :  { %v801_v10 = vmul.f32 %v1496_v7, %v799_v4  ;;  %vm806_vm5 = vweird.f32 %v1496_v7  ;;  %v1498_v41 = vpop.eup %1497 }
 0x9e3   :  { %vm807_vm7 = vmor %vm805_vm6, %vm806_vm5  ;;  %v780_v44 = vadd.f32 1.0, %v1498_v41 }
 0x9e4   :  { %v802_v13 = vsub.f32 1.0, %v801_v10 }
 0x9e5   :  { %1499 = vrcp.f32 %v780_v44  ;;  %v792_v53 = vand.u32 2147483648, %v780_v44  ;;  %vm786_vm12 = vweird.f32 %v780_v44  ;;  %v790_v54 = vand.u32 2147483647, %v780_v44 }
 0x9e6   :  { %v803_v37 = vmul.f32 %v1496_v7, %v802_v13 }
 0x9e7   :  { %v793_v56 = vor.u32 1.1754944e-38, %v792_v53  ;;  %vm791_vm14 = vcmp.eq.f32.partialorder %v790_v54, 8.507059e+37 }
 0x9e8   :  { %v804_v38 = vadd.f32 %v1496_v7, %v803_v37 }
 0x9ea   :  { %v808_v42 = vsel %vm807_vm7, %v1496_v7, %v804_v38 }
 0x9eb   :  { %v813_v45 = vsel %vm810_vm8, %v812_v43, %v808_v42  ;;  %v1500_v48 = vpop.eup %1499 }
 0x9ec   :  { %v782_v49 = vmul.f32 %v1500_v48, %v780_v44  ;;  %vm787_vm11 = vweird.f32 %v1500_v48  ;;  %v833_v61 = vmul.f32 %v831_v60, %v813_v45 }
 0x9ed   :  { %vm788_vm13 = vmor %vm786_vm12, %vm787_vm11 }
 0x9ee   :  { %v783_v50 = vsub.f32 1.0, %v782_v49 }
 0x9f0   :  { %v784_v51 = vmul.f32 %v1500_v48, %v783_v50 }
 0x9f2   :  { %v785_v52 = vadd.f32 %v1500_v48, %v784_v51 }
 0x9f4   :  { %v789_v55 = vsel %vm788_vm13, %v1500_v48, %v785_v52 }
 0x9f5   :  { %v794_v58 = vsel %vm791_vm14, %v793_v56, %v789_v55 }
 0x9f6   :  { %v818_v1 = vmul.f32 %v816_v0, %v794_v58 }
 0xa2a   :  { %v837_v46 = vpop.permute.xlu2 %836 }
 0xa2b   :  { %v839_v47 = vmul.f32 %v837_v46, %v813_v45 }
 0xa2d   :  { %841 = vrot.lane.b32.xlu1 %v839_v47, %s1637_s29 }
 0xa4a   :  { %v822_v57 = vpop.permute.xlu0 %821 }
 0xa4b   :  { %v824_v59 = vmul.f32 %v822_v57, %v794_v58 }
 0xa4d   :  { %826 = vrot.lane.b32.xlu2 %v824_v59, %s1637_s29 }
 0xa9f   :  { %v842_v62 = vpop.permute.xlu1 %841 }
 0xaa0   :  { %v1899_v63 = vadd.f32 %v842_v62, %v833_v61 }
 0xaa2   :  { %1501 = vtanh.f32 %v1899_v63  ;;  %v978_v60 = vrot.slane %v1899_v63, 2 }
 0xaa7   :  { %v827_v8 = vpop.permute.xlu2 %826 }
 0xaa8   :  { %v1502_v14 = vpop.eup %1501  ;;  %v1903_v16 = vadd.f32 %v827_v8, %v818_v1 }
 0xaa9   :  { %853 = vrot.lane.b32.xlu0 %v1502_v14, %s1636_s3 }
 0xaaa   :  { %1503 = vtanh.f32 %v1903_v16  ;;  %v963_v1 = vrot.slane %v1903_v16, 6 }
 0xab0   :  { %v1504_v20 = vpop.eup %1503 }
 0xab1   :  { %847 = vrot.lane.b32.xlu1 %v1504_v20, %s1636_s3 }
 0xb1b   :  { %v854_v2 = vpop.permute.xlu0 %853 }
 0xb1c   :  { %v1908_v22 = vmul.f32 %v854_v2, %v813_v45 }
 0xb1e   :  { %v895_v19 = vrot.slane %v1908_v22, 6 }
 0xb20   :  { %896 = vrot.lane.b32.xlu2 %v895_v19, %s1637_s29 }
 0xb23   :  { %v848_v3 = vpop.permute.xlu1 %847 }
 0xb24   :  { %v850_v25 = vmul.f32 %v848_v3, %v794_v58 }
 0xb26   :  { %858 = vrot.lane.b32.xlu0 %v850_v25, %s1637_s29 }
 0xb7a   :  { %v897_v15 = vpop.permute.xlu2 %896 }
 0xb7b   :  { %1401 = vmatmul.msk.f32.vlgmr.msrb.gmra.mxu3 %vm135_vm9, %v897_v15 }
 0xb98   :  { %v1914_v27 = vpop.permute.xlu0 %858 }
 0xb99   :  { %1400 = vmatmul.msk.f32.vlgmr.msra.gmra.mxu2 %vm135_vm9, %v1914_v27 }
 0xbfe   :  { %v917_v17 = vpop.f32.mrf.mxu3 }
 0xbff   :  { %v921_v29 = vrot.slane %v917_v17, 4 }
 0xc01   :  { %v923_v31 = vadd.f32 %v921_v29, %v894_v30 }
 0xc03   :  { %1505 = vtanh.f32 %v923_v31  ;;  %v1403_v11 = vmul.f32 -1.442695, %v923_v31 }
 0xc09   :  { %v1506_v32 = vpop.eup %1505 }
 0xc0a   :  { %983 = vrot.lane.b32.xlu1 %v1506_v32, %s1636_s3 }
 0xc1c   :  { %v887_v33 = vpop.f32.mrf.mxu2 }
 0xc1d   :  { %v891_v6 = vrot.slane %v887_v33, 6  ;;  %v1044_v33 = vld [vmem:[#allocation2] sm:$0xc] }
 0xc1f   :  { %v893_v34 = vadd.f32 %v891_v6, %v867_v9 }
 0xc21   :  { %1507 = vtanh.f32 %v893_v34  ;;  %v1402_v36 = vmul.f32 -1.442695, %v893_v34 }
 0xc22   :  { %1509 = vpow2.f32 %v1403_v11 }
 0xc23   :  { %1511 = vpow2.f32 %v1402_v36 }
 0xc27   :  { %v1508_v35 = vpop.eup %1507 }
 0xc28   :  { %968 = vrot.lane.b32.xlu2 %v1508_v35, %s1636_s3  ;;  %v1510_v4 = vpop.eup %1509  ;;  %v1014_v35 = vld [vmem:[#allocation2 + $0x18] sm:$0x30] }
 0xc29   :  { %v946_v7 = vadd.f32 1.0, %v1510_v4  ;;  %v1512_v10 = vpop.eup %1511 }
 0xc2a   :  { %v927_v13 = vadd.f32 1.0, %v1512_v10 }
 0xc2b   :  { %1513 = vrcp.f32 %v946_v7  ;;  %v958_v44 = vand.u32 2147483648, %v946_v7  ;;  %vm952_vm0 = vweird.f32 %v946_v7  ;;  %v956_v45 = vand.u32 2147483647, %v946_v7 }
 0xc2c   :  { %1515 = vrcp.f32 %v927_v13  ;;  %v939_v52 = vand.u32 2147483648, %v927_v13  ;;  %vm933_vm4 = vweird.f32 %v927_v13  ;;  %v937_v54 = vand.u32 2147483647, %v927_v13 }
 0xc2d   :  { %v959_v48 = vor.u32 1.1754944e-38, %v958_v44  ;;  %vm957_vm2 = vcmp.eq.f32.partialorder %v956_v45, 8.507059e+37 }
 0xc2e   :  { %v940_v56 = vor.u32 1.1754944e-38, %v939_v52  ;;  %vm938_vm6 = vcmp.eq.f32.partialorder %v937_v54, 8.507059e+37 }
 0xc31   :  { %v1514_v12 = vpop.eup %1513 }
 0xc32   :  { %v948_v37 = vmul.f32 %v1514_v12, %v946_v7  ;;  %v1516_v38 = vpop.eup %1515  ;;  %vm953_vm15 = vweird.f32 %v1514_v12 }
 0xc33   :  { %v929_v40 = vmul.f32 %v1516_v38, %v927_v13  ;;  %vm954_vm1 = vmor %vm952_vm0, %vm953_vm15  ;;  %vm934_vm3 = vweird.f32 %v1516_v38 }
 0xc34   :  { %v949_v39 = vsub.f32 1.0, %v948_v37  ;;  %vm935_vm5 = vmor %vm933_vm4, %vm934_vm3 }
 0xc35   :  { %v930_v42 = vsub.f32 1.0, %v929_v40 }
 0xc36   :  { %v950_v41 = vmul.f32 %v1514_v12, %v949_v39 }
 0xc37   :  { %v931_v46 = vmul.f32 %v1516_v38, %v930_v42 }
 0xc38   :  { %v951_v43 = vadd.f32 %v1514_v12, %v950_v41 }
 0xc39   :  { %v932_v49 = vadd.f32 %v1516_v38, %v931_v46 }
 0xc3a   :  { %v955_v47 = vsel %vm954_vm1, %v1514_v12, %v951_v43 }
 0xc3b   :  { %v960_v51 = vsel %vm957_vm2, %v959_v48, %v955_v47  ;;  %v936_v55 = vsel %vm935_vm5, %v1516_v38, %v932_v49 }
 0xc3c   :  { %v941_v57 = vsel %vm938_vm6, %v940_v56, %v936_v55  ;;  %v980_v61 = vmul.f32 %v978_v60, %v960_v51 }
 0xc3d   :  { %v965_v8 = vmul.f32 %v963_v1, %v941_v57 }
 0xc7c   :  { %v984_v50 = vpop.permute.xlu1 %983 }
 0xc7d   :  { %v986_v53 = vmul.f32 %v984_v50, %v960_v51 }
 0xc7f   :  { %988 = vrot.lane.b32.xlu0 %v986_v53, %s1637_s29 }
 0xc82   :  { %v969_v58 = vpop.permute.xlu2 %968 }
 0xc83   :  { %v971_v59 = vmul.f32 %v969_v58, %v941_v57 }
 0xc85   :  { %973 = vrot.lane.b32.xlu1 %v971_v59, %s1637_s29 }
 0xcf1   :  { %v989_v62 = vpop.permute.xlu0 %988 }
 0xcf2   :  { %v1923_v0 = vadd.f32 %v989_v62, %v980_v61 }
 0xcf4   :  { %1517 = vtanh.f32 %v1923_v0  ;;  %v1128_v1 = vrot.slane %v1923_v0, 2 }
 0xcf7   :  { %v974_v14 = vpop.permute.xlu1 %973 }
 0xcf8   :  { %v1927_v20 = vadd.f32 %v974_v14, %v965_v8 }
 0xcfa   :  { %v1518_v2 = vpop.eup %1517  ;;  %1519 = vtanh.f32 %v1927_v20 }
 0xcfb   :  { %1000 = vrot.lane.b32.xlu2 %v1518_v2, %s1636_s3 }
 0xd00   :  { %v1520_v19 = vpop.eup %1519 }
 0xd01   :  { %994 = vrot.lane.b32.xlu0 %v1520_v19, %s1636_s3 }
 0xd55   :  { %v1001_v63 = vpop.permute.xlu2 %1000 }
 0xd56   :  { %v1932_v3 = vmul.f32 %v1001_v63, %v960_v51  ;;  %v1113_v63 = vrot.slane %v1927_v20, 6 }
 0xd58   :  { %v1045_v25 = vrot.slane %v1932_v3, 4 }
 0xd5a   :  { %1046 = vrot.lane.b32.xlu1 %v1045_v25, %s1637_s29 }
 0xd73   :  { %v995_v16 = vpop.permute.xlu0 %994 }
 0xd74   :  { %v1936_v15 = vmul.f32 %v995_v16, %v941_v57 }
 0xd76   :  { %v1015_v17 = vrot.slane %v1936_v15, 2 }
 0xd78   :  { %1016 = vrot.lane.b32.xlu2 %v1015_v17, %s1637_s29 }
 0xdcc   :  { %v1047_v29 = vpop.permute.xlu1 %1046 }
 0xdcd   :  { %1405 = vmatmul.msk.f32.vlgmr.msra.gmra.mxu1 %vm135_vm9, %v1047_v29 }
 0xdd2   :  { %v1017_v30 = vpop.permute.xlu2 %1016 }
 0xdd3   :  { %1404 = vmatmul.msk.f32.vlgmr.msra.gmra.mxu0 %vm135_vm9, %v1017_v30 }
 0xe4a   :  { %v1067_v31 = vpop.f32.mrf.mxu1 }
 0xe4b   :  { %v1071_v32 = vrot.slane %v1067_v31, 6 }
 0xe4d   :  { %v1073_v6 = vadd.f32 %v1071_v32, %v1044_v33 }
 0xe4f   :  { %1521 = vtanh.f32 %v1073_v6  ;;  %v1407_v7 = vmul.f32 -1.442695, %v1073_v6 }
 0xe50   :  { %v1037_v9 = vpop.f32.mrf.mxu0 }
 0xe51   :  { %v1041_v34 = vrot.slane %v1037_v9, 4 }
 0xe53   :  { %v1043_v11 = vadd.f32 %v1041_v34, %v1014_v35  ;;  %v1194_v34 = vld [vmem:[#allocation2] sm:$0x3] }
 0xe55   :  { %v1522_v36 = vpop.eup %1521  ;;  %1523 = vtanh.f32 %v1043_v11  ;;  %v1406_v10 = vmul.f32 -1.442695, %v1043_v11 }
 0xe56   :  { %1133 = vrot.lane.b32.xlu0 %v1522_v36, %s1636_s3  ;;  %1525 = vpow2.f32 %v1407_v7  ;;  %v1164_v7 = vld [vmem:[#allocation2 + $0x18] sm:$0xc0] }
 0xe57   :  { %1527 = vpow2.f32 %v1406_v10 }
 0xe5b   :  { %v1524_v4 = vpop.eup %1523 }
 0xe5c   :  { %1118 = vrot.lane.b32.xlu1 %v1524_v4, %s1636_s3  ;;  %v1526_v13 = vpop.eup %1525 }
 0xe5d   :  { %v1096_v12 = vadd.f32 1.0, %v1526_v13  ;;  %v1528_v37 = vpop.eup %1527 }
 0xe5e   :  { %v1077_v38 = vadd.f32 1.0, %v1528_v37 }
 0xe5f   :  { %1529 = vrcp.f32 %v1096_v12  ;;  %v1108_v47 = vand.u32 2147483648, %v1096_v12  ;;  %vm1102_vm8 = vweird.f32 %v1096_v12  ;;  %v1106_v48 = vand.u32 2147483647, %v1096_v12 }
 0xe60   :  { %1531 = vrcp.f32 %v1077_v38  ;;  %v1089_v55 = vand.u32 2147483648, %v1077_v38  ;;  %vm1083_vm14 = vweird.f32 %v1077_v38  ;;  %v1087_v57 = vand.u32 2147483647, %v1077_v38 }
 0xe61   :  { %v1109_v51 = vor.u32 1.1754944e-38, %v1108_v47  ;;  %vm1107_vm12 = vcmp.eq.f32.partialorder %v1106_v48, 8.507059e+37 }
 0xe62   :  { %v1090_v59 = vor.u32 1.1754944e-38, %v1089_v55  ;;  %vm1088_vm0 = vcmp.eq.f32.partialorder %v1087_v57, 8.507059e+37 }
 0xe65   :  { %v1530_v39 = vpop.eup %1529 }
 0xe66   :  { %v1098_v40 = vmul.f32 %v1530_v39, %v1096_v12  ;;  %v1532_v41 = vpop.eup %1531  ;;  %vm1103_vm7 = vweird.f32 %v1530_v39 }
 0xe67   :  { %v1079_v43 = vmul.f32 %v1532_v41, %v1077_v38  ;;  %vm1104_vm11 = vmor %vm1102_vm8, %vm1103_vm7  ;;  %vm1084_vm13 = vweird.f32 %v1532_v41  ;;  %vm412_vm8 = vcmask 257026  }
 0xe68   :  { %v1099_v42 = vsub.f32 1.0, %v1098_v40  ;;  %vm1085_vm15 = vmor %vm1083_vm14, %vm1084_vm13  ;;  %vm418_vm13 = vcmask 521476   ;;  %vm713_vm14 = vcmask 261126  }
 0xe69   :  { %v1080_v45 = vsub.f32 1.0, %v1079_v43 }
 0xe6a   :  { %v1100_v44 = vmul.f32 %v1530_v39, %v1099_v42 }
 0xe6b   :  { %v1081_v49 = vmul.f32 %v1532_v41, %v1080_v45 }
 0xe6c   :  { %v1101_v46 = vadd.f32 %v1530_v39, %v1100_v44 }
 0xe6d   :  { %v1082_v52 = vadd.f32 %v1532_v41, %v1081_v49 }
 0xe6e   :  { %v1105_v50 = vsel %vm1104_vm11, %v1530_v39, %v1101_v46  ;;  %vm570_vm11 = vcmask 519426  }
 0xe6f   :  { %v1110_v54 = vsel %vm1107_vm12, %v1109_v51, %v1105_v50  ;;  %v1086_v58 = vsel %vm1085_vm15, %v1532_v41, %v1082_v52  ;;  %vm564_vm12 = vcmask 259076   ;;  %vm269_vm15 = vcmask 523526  }
 0xe70   :  { %v1091_v61 = vsel %vm1088_vm0, %v1090_v59, %v1086_v58  ;;  %v1130_v8 = vmul.f32 %v1128_v1, %v1110_v54  ;;  %vm719_vm0 = vcmask 517376  }
 0xe71   :  { %v1115_v25 = vmul.f32 %v1113_v63, %v1091_v61 }
 0xec8   :  { %v1134_v53 = vpop.permute.xlu0 %1133 }
 0xec9   :  { %v1136_v56 = vmul.f32 %v1134_v53, %v1110_v54 }
 0xecb   :  { %1138 = vrot.lane.b32.xlu2 %v1136_v56, %s1637_s29 }
 0xece   :  { %v1119_v60 = vpop.permute.xlu1 %1118 }
 0xecf   :  { %v1121_v62 = vmul.f32 %v1119_v60, %v1091_v61 }
 0xed1   :  { %1123 = vrot.lane.b32.xlu0 %v1121_v62, %s1637_s29 }
 0xf25   :  { %v1139_v14 = vpop.permute.xlu2 %1138 }
 0xf26   :  { %v1947_v2 = vadd.f32 %v1139_v14, %v1130_v8 }
 0xf28   :  { %1533 = vtanh.f32 %v1947_v2  ;;  %v1275_v63 = vrot.slane %v1947_v2, 2 }
 0xf2e   :  { %v1534_v19 = vpop.eup %1533 }
 0xf2f   :  { %1150 = vrot.lane.b32.xlu1 %v1534_v19, %s1636_s3 }
 0xf43   :  { %v1124_v16 = vpop.permute.xlu0 %1123 }
 0xf44   :  { %v1952_v17 = vadd.f32 %v1124_v16, %v1115_v25 }
 0xf46   :  { %1535 = vtanh.f32 %v1952_v17 }
 0xf4c   :  { %v1536_v29 = vpop.eup %1535 }
 0xf4d   :  { %1144 = vrot.lane.b32.xlu2 %v1536_v29, %s1636_s3 }
 0xfa1   :  { %v1151_v0 = vpop.permute.xlu1 %1150 }
 0xfa2   :  { %v1956_v30 = vmul.f32 %v1151_v0, %v1110_v54  ;;  %v1260_v0 = vrot.slane %v1952_v17, 6 }
 0xfa4   :  { %v1195_v31 = vrot.slane %v1956_v30, 2 }
 0xfa6   :  { %1196 = vrot.lane.b32.xlu0 %v1195_v31, %s1637_s29 }
 0xfa7   :  { %v1145_v32 = vpop.permute.xlu2 %1144 }
 0xfa8   :  { %v1960_v33 = vmul.f32 %v1145_v32, %v1091_v61 }
 0xfaa   :  { %v1165_v20 = vrot.slane %v1960_v33, 4 }
 0xfac   :  { %1166 = vrot.lane.b32.xlu1 %v1165_v20, %s1637_s29 }
0x1018   :  { %v1197_v6 = vpop.permute.xlu0 %1196 }
0x1019   :  { %1409 = vmatmul.msk.f32.vlgmr.msra.gmra.mxu3 %vm135_vm9, %v1197_v6 }
0x101e   :  { %v1167_v9 = vpop.permute.xlu1 %1166 }
0x101f   :  { %1408 = vmatmul.msk.f32.vlgmr.msrb.gmra.mxu2 %vm135_vm9, %v1167_v9 }
0x109c   :  { %v1217_v35 = vpop.f32.mrf.mxu3 }
0x109d   :  { %v1220_v11 = vadd.f32 %v1217_v35, %v1194_v34 }
0x109f   :  { %1537 = vtanh.f32 %v1220_v11  ;;  %v1411_v37 = vmul.f32 -1.442695, %v1220_v11 }
0x10a2   :  { %v1187_v36 = vpop.f32.mrf.mxu2 }
0x10a3   :  { %v1191_v4 = vrot.slane %v1187_v36, 2 }
0x10a5   :  { %v1538_v10 = vpop.eup %1537  ;;  %v1193_v13 = vadd.f32 %v1191_v4, %v1164_v7  ;;  %v1316_v7 = vld [vmem:[%s2052_s5 + $0x18] sm:$0xff] }
0x10a6   :  { %1280 = vrot.lane.b32.xlu2 %v1538_v10, %s1636_s3  ;;  %v1315_v10 = vld [vmem:[%s2052_s5 + $0x10] sm:$0xff] }
0x10a7   :  { %1539 = vtanh.f32 %v1193_v13  ;;  %v1410_v43 = vmul.f32 -1.442695, %v1193_v13  ;;  %v1314_v13 = vld [vmem:[%s2052_s5 + $0x8] sm:$0xff] }
0x10a8   :  { %1541 = vpow2.f32 %v1411_v37 }
0x10ad   :  { %v1540_v12 = vpop.eup %1539 }
0x10ae   :  { %1265 = vrot.lane.b32.xlu0 %v1540_v12, %s1636_s3  ;;  %v1542_v38 = vpop.eup %1541 }
0x10af   :  { %v1243_v39 = vadd.f32 1.0, %v1542_v38 }
0x10b1   :  { %1543 = vrcp.f32 %v1243_v39  ;;  %v1255_v46 = vand.u32 2147483648, %v1243_v39  ;;  %vm1249_vm1 = vweird.f32 %v1243_v39  ;;  %v1253_v47 = vand.u32 2147483647, %v1243_v39 }
0x10b2   :  { %1545 = vpow2.f32 %v1410_v43 }
0x10b3   :  { %v1256_v50 = vor.u32 1.1754944e-38, %v1255_v46  ;;  %vm1254_vm3 = vcmp.eq.f32.partialorder %v1253_v47, 8.507059e+37 }
0x10b7   :  { %v1544_v40 = vpop.eup %1543 }
0x10b8   :  { %v1245_v41 = vmul.f32 %v1544_v40, %v1243_v39  ;;  %vm1250_vm9 = vweird.f32 %v1544_v40  ;;  %v1546_v48 = vpop.eup %1545 }
0x10b9   :  { %vm1251_vm2 = vmor %vm1249_vm1, %vm1250_vm9  ;;  %v1224_v51 = vadd.f32 1.0, %v1546_v48  ;;  %vm1355_vm9 = vcmask 97280  }
0x10ba   :  { %v1246_v42 = vsub.f32 1.0, %v1245_v41  ;;  %v1424_v41 = vld [vmem:[%s2053_s6] ss:$0 sm:$0xff] }
0x10bb   :  { %1547 = vrcp.f32 %v1224_v51  ;;  %v1236_v60 = vand.u32 2147483648, %v1224_v51  ;;  %vm1230_vm5 = vweird.f32 %v1224_v51  ;;  %v1234_v61 = vand.u32 2147483647, %v1224_v51 }
0x10bc   :  { %v1247_v44 = vmul.f32 %v1544_v40, %v1246_v42 }
0x10bd   :  { %v1237_v1 = vor.u32 1.1754944e-38, %v1236_v60  ;;  %vm1235_vm7 = vcmp.eq.f32.partialorder %v1234_v61, 8.507059e+37 }
0x10be   :  { %v1248_v45 = vadd.f32 %v1544_v40, %v1247_v44 }
0x10c0   :  { %v1252_v49 = vsel %vm1251_vm2, %v1544_v40, %v1248_v45 }
0x10c1   :  { %v1257_v52 = vsel %vm1254_vm3, %v1256_v50, %v1252_v49  ;;  %v1548_v55 = vpop.eup %1547 }
0x10c2   :  { %v1226_v56 = vmul.f32 %v1548_v55, %v1224_v51  ;;  %vm1231_vm4 = vweird.f32 %v1548_v55  ;;  %v1277_v25 = vmul.f32 %v1275_v63, %v1257_v52 }
0x10c3   :  { %vm1232_vm6 = vmor %vm1230_vm5, %vm1231_vm4 }
0x10c4   :  { %v1227_v57 = vsub.f32 1.0, %v1226_v56 }
0x10c6   :  { %v1228_v58 = vmul.f32 %v1548_v55, %v1227_v57 }
0x10c8   :  { %v1229_v59 = vadd.f32 %v1548_v55, %v1228_v58 }
0x10ca   :  { %v1233_v62 = vsel %vm1232_vm6, %v1548_v55, %v1229_v59 }
0x10cb   :  { %v1238_v14 = vsel %vm1235_vm7, %v1237_v1, %v1233_v62 }
0x10cc   :  { %v1262_v31 = vmul.f32 %v1260_v0, %v1238_v14 }
0x1100   :  { %v1281_v53 = vpop.permute.xlu2 %1280 }
0x1101   :  { %v1283_v54 = vmul.f32 %v1281_v53, %v1257_v52 }
0x1103   :  { %1285 = vrot.lane.b32.xlu1 %v1283_v54, %s1637_s29 }
0x1120   :  { %v1266_v8 = vpop.permute.xlu0 %1265 }
0x1121   :  { %v1268_v19 = vmul.f32 %v1266_v8, %v1238_v14 }
0x1123   :  { %1270 = vrot.lane.b32.xlu2 %v1268_v19, %s1637_s29 }
0x112b   :  { %409 = vrot.lane.b32.xlu2 %v1824_v23, %s1637_s29 }
0x1133   :  { %863 = vrot.lane.b32.xlu2 %v1908_v22, %s1636_s3 }
0x113b   :  { %567 = vrot.lane.b32.xlu2 %v1852_v26, %s1636_s3 }
0x1175   :  { %v1286_v16 = vpop.permute.xlu1 %1285 }
0x1176   :  { %v1288_v29 = vadd.f32 %v1286_v16, %v1277_v25 }
0x1178   :  { %1549 = vtanh.f32 %v1288_v29 }
0x117d   :  { %v1271_v32 = vpop.permute.xlu2 %1270 }
0x117e   :  { %v1550_v20 = vpop.eup %1549  ;;  %v1273_v6 = vadd.f32 %v1271_v32, %v1262_v31 }
0x117f   :  { %1297 = vrot.lane.b32.xlu0 %v1550_v20, %s1636_s3 }
0x1180   :  { %1551 = vtanh.f32 %v1273_v6 }
0x1185   :  { %v410_v23 = vpop.permute.xlu2 %409 }
0x1186   :  { %v1552_v22 = vpop.eup %1551  ;;  %413 = vst.msk [vmem:[#allocation3] sm:$0xc] %vm412_vm8, %v410_v23 }
0x1187   :  { %561 = vrot.lane.b32.xlu0 %v1856_v28, %s1637_s29  ;;  %1291 = vrot.lane.b32.xlu1 %v1552_v22, %s1636_s3 }
0x118d   :  { %v864_v26 = vpop.permute.xlu2 %863 }
0x118f   :  { %1010 = vrot.lane.b32.xlu0 %v1932_v3, %s1636_s3  ;;  %710 = vrot.lane.b32.xlu1 %v1888_v5, %s1637_s29 }
0x1195   :  { %v568_v2 = vpop.permute.xlu2 %567 }
0x1196   :  { %571 = vst.msk [vmem:[#allocation3 + $0x8] sm:$0xc] %vm570_vm11, %v568_v2 }
0x1197   :  { %266 = vrot.lane.b32.xlu0 %v1790_v18, %s1636_s3  ;;  %1160 = vrot.lane.b32.xlu1 %v1956_v30, %s1636_s3  ;;  %v1317_v30 = vld [vmem:[%s2052_s5 + $0x20] sm:$0xff] }
0x119f   :  { %716 = vrot.lane.b32.xlu0 %v1884_v24, %s1636_s3  ;;  %415 = vrot.lane.b32.xlu1 %v1820_v21, %s1636_s3  ;;  %v1320_v24 = vld [vmem:[%s2052_s5 + $0x38] sm:$0xff]  ;;  %v1319_v21 = vld [vmem:[%s2052_s5 + $0x30] sm:$0xff] }
0x11a0   :  { %1340 = vmatpush.msrb.mxu0 %v1320_v24 }
0x11a2   :  { %1341 = vmatpush.msrb.mxu0 %v1319_v21 }
0x11a7   :  { %1005 = vrot.lane.b32.xlu1 %v1936_v15, %s1637_s29  ;;  %v1318_v15 = vld [vmem:[%s2052_s5 + $0x28] sm:$0xff] }
0x11a8   :  { %1342 = vmatpush.msrb.mxu0 %v1318_v15 }
0x11aa   :  { %1343 = vmatpush.msrb.mxu0 %v1317_v30 }
0x11ac   :  { %1344 = vmatpush.msrb.mxu0 %v1316_v7 }
0x11ae   :  { %1345 = vmatpush.msrb.mxu0 %v1315_v10 }
0x11b0   :  { %1346 = vmatpush.msrb.mxu0 %v1314_v13 }
0x11f1   :  { %v1298_v28 = vpop.permute.xlu0 %1297 }
0x11f2   :  { %v1300_v5 = vmul.f32 %v1298_v28, %v1257_v52 }
0x11f4   :  { %1307 = vrot.lane.b32.xlu2 %v1300_v5, %s1636_s3 }
0x11f9   :  { %v562_v3 = vpop.permute.xlu0 %561  ;;  %v1292_v17 = vpop.permute.xlu1 %1291 }
0x11fa   :  { %565 = vst.msk [vmem:[#allocation3] sm:$0x30] %vm564_vm12, %v562_v3  ;;  %v1294_v18 = vmul.f32 %v1292_v17, %v1238_v14 }
0x11fc   :  { %1155 = vrot.lane.b32.xlu2 %v1960_v33, %s1637_s29  ;;  %1302 = vrot.lane.b32.xlu0 %v1294_v18, %s1637_s29 }
0x1201   :  { %v1011_v9 = vpop.permute.xlu0 %1010  ;;  %v711_v34 = vpop.permute.xlu1 %710 }
0x1202   :  { %1013 = vst.msk [vmem:[#allocation3] sm:$0x30] %vm418_vm13, %v1011_v9 }
0x1203   :  { %714 = vst.msk [vmem:[#allocation3] sm:$0xc0] %vm713_vm14, %v711_v34 }
0x1204   :  { %866 = vst.msk [vmem:[#allocation3] sm:$0xc0] %vm269_vm15, %v864_v26 }
0x1209   :  { %v267_v33 = vpop.permute.xlu0 %266  ;;  %v1161_v35 = vpop.permute.xlu1 %1160 }
0x120a   :  { %270 = vst.msk [vmem:[#allocation3 + $0x8] sm:$0xc0] %vm269_vm15, %v267_v33 }
0x120b   :  { %1163 = vst.msk [vmem:[#allocation3] sm:$0xc] %vm570_vm11, %v1161_v35 }
0x1211   :  { %v717_v11 = vpop.permute.xlu0 %716  ;;  %v416_v36 = vpop.permute.xlu1 %415 }
0x1212   :  { %720 = vst.msk [vmem:[#allocation3 + $0x8] sm:$0x3] %vm719_vm0, %v717_v11 }
0x1213   :  { %861 = vst.msk [vmem:[#allocation3 + $0x8] sm:$0x3] %vm263_vm10, %v1914_v27  ;;  %v1313_v27 = vld [vmem:[%s2052_s5] sm:$0xff]  ;;  %vm1325_vm10 = vcmask 523264   ;;  %s1638_s5 = smov [#allocation9]  }
0x1214   :  { %419 = vst.msk [vmem:[#allocation3 + $0x8] sm:$0x30] %vm418_vm13, %v416_v36  ;;  %1347 = vmatpush.msrb.mxu0 %v1313_v27  ;;  %s1362_s24 = sshll.u32 %s1638_s5, 4  ;;  %s1363_s24 = int_to_ptr.vmem [resolvable:$true] %s1362_s24 }
0x1219   :  { %v1006_v4 = vpop.permute.xlu1 %1005 }
0x121a   :  { %1008 = vst.msk [vmem:[#allocation3 + $0x8] sm:$0xc] %vm412_vm8, %v1006_v4 }
0x124e   :  { %v1308_v12 = vpop.permute.xlu2 %1307 }
0x124f   :  { %1310 = vst.msk [vmem:[#allocation3] sm:$0x3] %vm719_vm0, %v1308_v12 }
0x1256   :  { %v1156_v37 = vpop.permute.xlu2 %1155  ;;  %v1311_v38 = vld [vmem:[#allocation3] sm:$0xff] }
0x1257   :  { %1158 = vst.msk [vmem:[#allocation3 + $0x8] sm:$0x30] %vm564_vm12, %v1156_v37  ;;  %1412 = vmatmul.msk.f32.vlgmr.msrb.gmra.mxu0 %vm1325_vm10, %v1311_v38 }
0x126e   :  { %v1303_v39 = vpop.permute.xlu0 %1302 }
0x126f   :  { %1305 = vst.msk [vmem:[#allocation3 + $0x8] sm:$0xc0] %vm713_vm14, %v1303_v39 }
0x1276   :  { %v1312_v40 = vld [vmem:[#allocation3 + $0x8] sm:$0xff] }
0x1277   :  { %1413 = vmatmul.msk.f32.gmra.mxu0 %vm1325_vm10, %v1312_v40 }
0x12d4   :  { %v1349_v42 = vpop.f32.mrf.mxu0 }
0x12d5   :  { %v1350_v43 = vadd.f32 %v1424_v41, %v1349_v42 }
0x12d7   :  { %1356 = vst.msk [vmem:[#allocation9] sm:$0xff] %vm1355_vm9, %v1350_v43 }
0x12f4   :  { %v1352_v44 = vpop.f32.mrf.mxu0 }
0x12f5   :  { %v1353_v45 = vadd.f32 %v1424_v41, %v1352_v44 }
0x12f7   :  { %1357 = vst.msk [vmem:[#allocation9 + $0x8] sm:$0xff] %vm1355_vm9, %v1353_v45 }
0x12f8   :  { %1370 = dma.vmem_to_hbm [thread:$0]  %s1363_s24, 256, %s1365_s27, [#allocation6], %s1633_s11, %s1633_s11, %s1634_s12  }
0x12f9   :  { %1629 = dma.done.wait [#allocation6], 256  }
0x12fa   :  { %1630 = vsyncadd [#allocation6], 4294967040 }
0x12fb   :  { %1375 = vsyncpa [#allocation5], 1 }
0x12fc   :  { %1376 = vsyncpa [#allocation8], 1 }
0x12fd   :  { %1377 = vsyncpa [#allocation6], 1 }

</bundles_post_ra>
